<compile_context>
chip_gen: v5e
topology: v5e:2x2
jax: 0.10.0
libtpu: 0.0.40
codegen_flags: <defaults>
</compile_context>

<pallas_src>
import functools
import numpy as np
import jax
import jax.numpy as jnp
from jax import lax
from jax.experimental import pallas as pl
from jax.experimental.pallas import tpu as pltpu


# -----------------------------------------------------------------------------
# Pallas kernel
# -----------------------------------------------------------------------------
def _make_kernel(atom1s, atom2s, n_rot, n_atoms_p, tile_conf, sub_lanes):
    """Per-conformer-tile kernel with static bond atom indices.

    Block shapes seen by the kernel:
      params_ref : (6 + n_rot, tile_conf)    per-conformer parameters (transposed)
      base_ref   : (n_atoms_p, 3)            base molecule coordinates (atom-padded)
      bmask_ref  : (n_atoms_p, n_rot_pad)    1.0 where the atom belongs to branch b
      out_ref    : (3, n_atoms_p, tile_conf) x/y/z planes, conformers on lanes
    """
    SUB = sub_lanes
    n_sub = tile_conf // SUB

    def kernel(params_ref, base_ref, bmask_ref, out_ref):
        # ---- loop-invariant hoists (computed once per grid step) -----------
        # Base coords broadcast across the conformer (lane) axis.
        x0 = jnp.broadcast_to(base_ref[:, 0:1], (n_atoms_p, SUB))
        y0 = jnp.broadcast_to(base_ref[:, 1:2], (n_atoms_p, SUB))
        z0 = jnp.broadcast_to(base_ref[:, 2:3], (n_atoms_p, SUB))

        # Per-bond branch-membership planes (float, broadcast once; the cheap
        # != 0 compare happens once per bond per sub-tile).
        mask_planes = [
            jnp.broadcast_to(bmask_ref[:, b:b + 1], (n_atoms_p, SUB))
            for b in range(n_rot)
        ]

        def process(off):
            # One small load of the parameter slab for this lane sub-tile.
            p = params_ref[:, pl.ds(off, SUB)]            # (n_params, SUB)

            x, y, z = x0, y0, z0

            if n_rot > 0:
                # Batched transcendentals over the whole torsion-angle slab.
                rot_angles = p[6:6 + n_rot, :]            # (n_rot, SUB)
                cos_all = jnp.cos(rot_angles)
                sin_all = jnp.sin(rot_angles)

            # --- rotatable-bond (Rodrigues) rotations, sequential ------------
            # TODO(synk): for molecules with many rotatable bonds, move
            # atom1/atom2 into SMEM and convert this unrolled loop into
            # lax.fori_loop with pl.ds dynamic sublane indexing to bound code
            # size / vreg live ranges.
            for b in range(n_rot):
                a1 = atom1s[b]
                a2 = atom2s[b]
                cosA = cos_all[b:b + 1, :]                # (1, SUB) row
                sinA = sin_all[b:b + 1, :]
                omc = 1.0 - cosA

                # bond pivot / axis: sublane slices, row-shaped
                x1 = x[a1:a1 + 1, :]
                y1 = y[a1:a1 + 1, :]
                z1 = z[a1:a1 + 1, :]
                kx = x[a2:a2 + 1, :] - x1
                ky = y[a2:a2 + 1, :] - y1
                kz = z[a2:a2 + 1, :] - z1
                inv = lax.rsqrt(kx * kx + ky * ky + kz * kz + 1e-20)  # EUP
                kx = kx * inv
                ky = ky * inv
                kz = kz * inv

                # re-associated Rodrigues: row multiplies, not plane multiplies
                kxo = kx * omc
                kyo = ky * omc
                kzo = kz * omc

                # coordinates relative to atom1 (full planes)
                px = x - x1
                py = y - y1
                pz = z - z1

                kdotp = kx * px + ky * py + kz * pz
                cxv = ky * pz - kz * py                   # k x p
                cyv = kz * px - kx * pz
                czv = kx * py - ky * px

                rx = px * cosA + cxv * sinA + kxo * kdotp + x1
                ry = py * cosA + cyv * sinA + kyo * kdotp + y1
                rz = pz * cosA + czv * sinA + kzo * kdotp + z1

                # branch blend: single select per coordinate (vsel)
                mb = mask_planes[b] != 0.0
                x = jnp.where(mb, rx, x)
                y = jnp.where(mb, ry, y)
                z = jnp.where(mb, rz, z)

            # --- Euler angles -> quaternion -> rotation matrix ---------------
            half = p[3:6, :] * 0.5                        # (3, SUB)
            ch = jnp.cos(half)
            sh = jnp.sin(half)
            cxh, cyh, czh = ch[0:1, :], ch[1:2, :], ch[2:3, :]
            sxh, syh, szh = sh[0:1, :], sh[1:2, :], sh[2:3, :]

            qw = cxh * cyh * czh + sxh * syh * szh
            qx = sxh * cyh * czh - cxh * syh * szh
            qy = cxh * syh * czh + sxh * cyh * szh
            qz = cxh * cyh * szh - sxh * syh * czh

            xx = 2.0 * qx * qx
            yy = 2.0 * qy * qy
            zz = 2.0 * qz * qz
            xy = 2.0 * qx * qy
            xz = 2.0 * qx * qz
            yz = 2.0 * qy * qz
            xw = 2.0 * qx * qw
            yw = 2.0 * qy * qw
            zw = 2.0 * qz * qw

            R00 = 1.0 - yy - zz
            R01 = xy - zw
            R02 = xz + yw
            R10 = xy + zw
            R11 = 1.0 - xx - zz
            R12 = yz - xw
            R20 = xz - yw
            R21 = yz + xw
            R22 = 1.0 - xx - yy

            # --- rigid rotation + translation, lane-dense stores --------------
            tx = p[0:1, :]
            ty = p[1:2, :]
            tz = p[2:3, :]

            out_ref[0, :, pl.ds(off, SUB)] = R00 * x + R01 * y + R02 * z + tx
            out_ref[1, :, pl.ds(off, SUB)] = R10 * x + R11 * y + R12 * z + ty
            out_ref[2, :, pl.ds(off, SUB)] = R20 * x + R21 * y + R22 * z + tz

        if n_sub == 1:
            process(0)
        else:
            # Bounded live ranges: each iteration only keeps (n_atoms_p, SUB)
            # planes live, keeping the kernel VALU-bound and spill-free.
            @pl.loop(0, n_sub)
            def _(step):
                process(pl.multiple_of(step * SUB, SUB))

    return kernel


def drug_conformation_forward(conf_params, base_coords, rotatable_bonds,
                              branch_atoms, *, tile_conf=512, sub_lanes=128,
                              planar_output=False):
    """Pallas implementation of DrugConformation._compute_atom_coordinates().

    conf_params    : (n_conformers, 6 + n_rot) float32
    base_coords    : (n_atoms, 3) float32
    rotatable_bonds: list of (atom1, atom2) static int pairs
    branch_atoms   : list of lists of atom indices (static)
    returns        : (n_conformers, n_atoms, 3) float32  (PyTorch layout), or
                     the padded planar (3, n_atoms_p, n_conf_p) slab when
                     planar_output=True (skips the epilogue slice+transpose).
    """
    conf_params = jnp.asarray(conf_params, jnp.float32)
    base_coords = jnp.asarray(base_coords, jnp.float32)
    n_conf, n_params = conf_params.shape
    n_atoms = base_coords.shape[0]
    n_rot = len(rotatable_bonds)
    assert n_params == 6 + n_rot

    # Lane-dense conformer tiles (multiple of 128).  Keep >= 2 grid steps when
    # possible so both v7x TensorCores receive work.
    tile_conf = max(128, (tile_conf // 128) * 128)
    n_conf_128 = ((n_conf + 127) // 128) * 128
    half_tiles = (n_conf_128 // 2 // 128) * 128
    if half_tiles >= 128:
        tile_conf = min(tile_conf, half_tiles)
    sub_lanes = max(128, (sub_lanes // 128) * 128)
    sub_lanes = min(sub_lanes, tile_conf)
    if tile_conf % sub_lanes != 0:
        sub_lanes = 128

    n_pad = (-n_conf) % tile_conf
    n_conf_p = n_conf + n_pad

    # conformers -> lanes: params transposed to (n_params, n_conf_p).
    # TODO(synk): if this wrapper sits in a hot optimization loop, have the
    # producer store parameters as (n_params, n_conf) to avoid this transpose.
    params_t = conf_params.T
    if n_pad:
        # zero params for padded conformers are safe (identity transforms).
        params_t = jnp.pad(params_t, ((0, 0), (0, n_pad)))

    # Pad atoms to a sublane multiple (8): output stores become unmasked vst.
    n_atoms_p = ((n_atoms + 7) // 8) * 8
    base_p = base_coords
    if n_atoms_p != n_atoms:
        base_p = jnp.pad(base_coords, ((0, n_atoms_p - n_atoms), (0, 0)))

    atom1s = tuple(int(b[0]) for b in rotatable_bonds)
    atom2s = tuple(int(b[1]) for b in rotatable_bonds)

    # Branch membership mask (n_atoms_p, n_rot), 1.0 where the atom is rotated.
    bmask = np.zeros((n_atoms_p, max(n_rot, 1)), dtype=np.float32)
    for b, branch in enumerate(branch_atoms):
        bmask[np.asarray(branch, dtype=np.int64), b] = 1.0
    bmask = jnp.asarray(bmask)

    kernel = _make_kernel(atom1s, atom2s, n_rot, n_atoms_p, tile_conf, sub_lanes)
    grid = (n_conf_p // tile_conf,)

    out = pl.pallas_call(
        kernel,
        out_shape=jax.ShapeDtypeStruct((3, n_atoms_p, n_conf_p), jnp.float32),
        grid_spec=pltpu.PrefetchScalarGridSpec(
            num_scalar_prefetch=0,
            grid=grid,
            in_specs=[
                pl.BlockSpec((n_params, tile_conf), lambda i: (0, i)),
                pl.BlockSpec((n_atoms_p, 3), lambda i: (0, 0)),
                pl.BlockSpec((n_atoms_p, bmask.shape[1]), lambda i: (0, 0)),
            ],
            out_specs=pl.BlockSpec((3, n_atoms_p, tile_conf),
                                   lambda i: (0, 0, i)),
        ),
        compiler_params=pltpu.CompilerParams(
            dimension_semantics=("parallel",)),
    )(params_t, base_p, bmask)

    if planar_output:
        # Consumers that accept the planar layout skip the epilogue entirely
        # (padded rows/lanes hold identity-transformed / zero-atom garbage).
        return out

    # Epilogue to the PyTorch layout (n_conf, n_atoms, 3).  This is a separate
    # XLA pass over HBM; prefer planar_output=True when the consumer allows.
    return jnp.transpose(out[:, :n_atoms, :n_conf], (2, 1, 0))


# -----------------------------------------------------------------------------
# Pure-JAX reference (mirrors the PyTorch math) for a correctness check
# -----------------------------------------------------------------------------
def reference_forward(base_coords, params, bonds, branch_lists):
    N = params.shape[0]
    coords = jnp.broadcast_to(base_coords[None], (N,) + base_coords.shape)
    for b, ((a1, a2), branch) in enumerate(zip(bonds, branch_lists)):
        branch = jnp.asarray(branch, jnp.int32)
        ang = params[:, 6 + b]
        k = coords[:, a2] - coords[:, a1]
        k = k / jnp.linalg.norm(k, axis=1, keepdims=True)
        cosA = jnp.cos(ang)[:, None, None]
        sinA = jnp.sin(ang)[:, None, None]
        K = jnp.zeros((N, 3, 3), jnp.float32)
        K = K.at[:, 0, 1].set(-k[:, 2]).at[:, 0, 2].set(k[:, 1])
        K = K.at[:, 1, 0].set(k[:, 2]).at[:, 1, 2].set(-k[:, 0])
        K = K.at[:, 2, 0].set(-k[:, 1]).at[:, 2, 1].set(k[:, 0])
        I = jnp.eye(3, dtype=jnp.float32)[None]
        kkt = jnp.einsum('ni,nj->nij', k, k)
        R = I * cosA + K * sinA + kkt * (1 - cosA)
        rel = coords[:, branch] - coords[:, a1:a1 + 1]
        rot = jnp.einsum('nbj,nij->nbi', rel, R)               # bmm(rel, R^T)
        coords = coords.at[:, branch].set(rot + coords[:, a1:a1 + 1])

    half = params[:, 3:6] * 0.5
    cx, cy, cz = jnp.cos(half[:, 0]), jnp.cos(half[:, 1]), jnp.cos(half[:, 2])
    sx, sy, sz = jnp.sin(half[:, 0]), jnp.sin(half[:, 1]), jnp.sin(half[:, 2])
    qw = cx * cy * cz + sx * sy * sz
    qx = sx * cy * cz - cx * sy * sz
    qy = cx * sy * cz + sx * cy * sz
    qz = cx * cy * sz - sx * sy * cz
    R = jnp.stack([
        jnp.stack([1 - 2 * qy * qy - 2 * qz * qz, 2 * qx * qy - 2 * qz * qw, 2 * qx * qz + 2 * qy * qw], axis=-1),
        jnp.stack([2 * qx * qy + 2 * qz * qw, 1 - 2 * qx * qx - 2 * qz * qz, 2 * qy * qz - 2 * qx * qw], axis=-1),
        jnp.stack([2 * qx * qz - 2 * qy * qw, 2 * qy * qz + 2 * qx * qw, 1 - 2 * qx * qx - 2 * qy * qy], axis=-1),
    ], axis=-2)                                                # (N, 3, 3)
    coords = jnp.einsum('naj,nij->nai', coords, R)             # bmm(coords, R^T)
    coords = coords + params[:, None, :3]
    return coords


# -----------------------------------------------------------------------------
# Deterministic synthetic setup (replaces RDKit molecule + __init__)
# -----------------------------------------------------------------------------
def build_inputs():
    n_conformers = 1000       # pads to 1024 -> 2 lane-dense grid steps of 512
    n_atoms = 12
    surface_distance = 0.0

    # Synthetic "molecule": base coordinates + rotatable bonds + branch lists.
    # TODO(synk): topology normally comes from RDKit bond/ring analysis.
    rotatable_bonds = [(2, 3), (5, 6)]
    branch_atoms = [[3, 4, 5, 6, 7, 8, 9, 10, 11], [6, 7, 8, 9, 10, 11]]
    n_rot = len(rotatable_bonds)

    key = jax.random.PRNGKey(0)
    k_prot, k_base, k_theta, k_phi, k_orient, k_rot = jax.random.split(key, 6)

    protein_coords = jax.random.normal(k_prot, (32, 3), jnp.float32) * 5.0
    base_coords = jax.random.normal(k_base, (n_atoms, 3), jnp.float32) * 2.0

    # _initialize_near_surface (glue: plain JAX, deterministic)
    center = protein_coords.mean(axis=0)
    radius = jnp.max(jnp.linalg.norm(protein_coords - center, axis=1))
    theta = jax.random.uniform(k_theta, (n_conformers,)) * 2.0 * np.pi
    phi = jnp.arccos(2.0 * jax.random.uniform(k_phi, (n_conformers,)) - 1.0)
    r = radius + surface_distance
    px = r * jnp.sin(phi) * jnp.cos(theta)
    py = r * jnp.sin(phi) * jnp.sin(theta)
    pz = r * jnp.cos(phi)
    positions = jnp.stack([px, py, pz], axis=1) + center
    orientations = jax.random.uniform(k_orient, (n_conformers, 3)) * 2.0 * np.pi
    rot_angles = jax.random.uniform(k_rot, (n_conformers, n_rot)) * 2.0 * np.pi
    conf_params = jnp.concatenate(
        [positions, orientations, rot_angles], axis=1).astype(jnp.float32)

    return conf_params, base_coords, rotatable_bonds, branch_atoms


if __name__ == "__main__":
    conf_params, base_coords, bonds, branches = build_inputs()

    fwd = jax.jit(functools.partial(
        drug_conformation_forward,
        rotatable_bonds=bonds, branch_atoms=branches,
        tile_conf=512, sub_lanes=128))
    coords = fwd(conf_params, base_coords)
    coords = jax.block_until_ready(coords)

    # correctness check against pure-JAX reference of the PyTorch math
    ref = reference_forward(base_coords, conf_params, bonds, branches)
    np.testing.assert_allclose(np.asarray(coords), np.asarray(ref),
                               rtol=1e-4, atol=1e-4)
    assert coords.shape == (conf_params.shape[0], base_coords.shape[0], 3)
    assert coords.dtype == jnp.float32

    print("KERNEL_OK")
</pallas_src>

<mosaic_0001>
module attributes {stable_mosaic.version = 11 : i64} {
  func.func @kernel(%arg0: i32, %arg1: memref<8x512xf32, #tpu.memory_space<vmem>>, %arg2: memref<16x3xf32, #tpu.memory_space<vmem>>, %arg3: memref<16x2xf32, #tpu.memory_space<vmem>>, %arg4: memref<3x16x512xf32, #tpu.memory_space<vmem>>) attributes {dimension_semantics = [#tpu.dimension_semantics<parallel>], iteration_bounds = array<i64: 2>, scalar_prefetch = 0 : i64, scratch_operands = 0 : i64, tpu.core_type = #tpu.core_type<tc>, window_params = [{transform_indices = @transform_0, window_bounds = array<i64: 8, 512>}, {pipeline_mode = #tpu.pipeline_mode<synchronous>, transform_indices = @transform_1, window_bounds = array<i64: 16, 3>}, {pipeline_mode = #tpu.pipeline_mode<synchronous>, transform_indices = @transform_2, window_bounds = array<i64: 16, 2>}, {transform_indices = @transform_3, window_bounds = array<i64: 3, 16, 512>}]} {
    %c0 = arith.constant 0 : index
    %c0_0 = arith.constant 0 : index
    %0 = vector.load %arg2[%c0, %c0_0] : memref<16x3xf32, #tpu.memory_space<vmem>>, vector<16x1xf32>
    %1 = vector.shape_cast %0 : vector<16x1xf32> to vector<16x1xf32>
    %2 = vector.broadcast %1 : vector<16x1xf32> to vector<16x128xf32>
    %c0_1 = arith.constant 0 : index
    %c1 = arith.constant 1 : index
    %3 = vector.load %arg2[%c0_1, %c1] : memref<16x3xf32, #tpu.memory_space<vmem>>, vector<16x1xf32>
    %4 = vector.shape_cast %3 : vector<16x1xf32> to vector<16x1xf32>
    %5 = vector.broadcast %4 : vector<16x1xf32> to vector<16x128xf32>
    %c0_2 = arith.constant 0 : index
    %c2 = arith.constant 2 : index
    %6 = vector.load %arg2[%c0_2, %c2] : memref<16x3xf32, #tpu.memory_space<vmem>>, vector<16x1xf32>
    %7 = vector.shape_cast %6 : vector<16x1xf32> to vector<16x1xf32>
    %8 = vector.broadcast %7 : vector<16x1xf32> to vector<16x128xf32>
    %c0_3 = arith.constant 0 : index
    %c0_4 = arith.constant 0 : index
    %9 = vector.load %arg3[%c0_3, %c0_4] : memref<16x2xf32, #tpu.memory_space<vmem>>, vector<16x1xf32>
    %10 = vector.shape_cast %9 : vector<16x1xf32> to vector<16x1xf32>
    %11 = vector.broadcast %10 : vector<16x1xf32> to vector<16x128xf32>
    %c0_5 = arith.constant 0 : index
    %c1_6 = arith.constant 1 : index
    %12 = vector.load %arg3[%c0_5, %c1_6] : memref<16x2xf32, #tpu.memory_space<vmem>>, vector<16x1xf32>
    %13 = vector.shape_cast %12 : vector<16x1xf32> to vector<16x1xf32>
    %14 = vector.broadcast %13 : vector<16x1xf32> to vector<16x128xf32>
    %c0_i32 = arith.constant 0 : i32
    %c4_i32 = arith.constant 4 : i32
    %15 = arith.addi %c0_i32, %c4_i32 : i32
    %c1_i32 = arith.constant 1 : i32
    scf.for %arg5 = %c0_i32 to %15 step %c1_i32  : i32 {
      %c1_i32_8 = arith.constant 1 : i32
      %16 = arith.muli %arg5, %c1_i32_8 : i32
      %c0_i32_9 = arith.constant 0 : i32
      %17 = arith.addi %c0_i32_9, %16 : i32
      %c128_i32 = arith.constant 128 : i32
      %18 = arith.muli %17, %c128_i32 : i32
      %19 = tpu.assume_multiple %18, 128 : i32
      %c0_10 = arith.constant 0 : index
      %20 = arith.index_cast %19 : i32 to index
      %21 = vector.load %arg1[%c0_10, %20] : memref<8x512xf32, #tpu.memory_space<vmem>>, vector<8x128xf32>
      %22 = vector.extract_strided_slice %21 {offsets = [6, 0], sizes = [2, 128], strides = [1, 1]} : vector<8x128xf32> to vector<2x128xf32>
      %23 = math.cos %22 : vector<2x128xf32>
      %24 = math.sin %22 : vector<2x128xf32>
      %25 = vector.extract_strided_slice %23 {offsets = [0, 0], sizes = [1, 128], strides = [1, 1]} : vector<2x128xf32> to vector<1x128xf32>
      %26 = vector.extract_strided_slice %24 {offsets = [0, 0], sizes = [1, 128], strides = [1, 1]} : vector<2x128xf32> to vector<1x128xf32>
      %cst = arith.constant 1.000000e+00 : f32
      %27 = vector.broadcast %cst : f32 to vector<1x128xf32>
      %28 = arith.subf %27, %25 : vector<1x128xf32>
      %29 = vector.extract_strided_slice %2 {offsets = [2, 0], sizes = [1, 128], strides = [1, 1]} : vector<16x128xf32> to vector<1x128xf32>
      %30 = vector.extract_strided_slice %5 {offsets = [2, 0], sizes = [1, 128], strides = [1, 1]} : vector<16x128xf32> to vector<1x128xf32>
      %31 = vector.extract_strided_slice %8 {offsets = [2, 0], sizes = [1, 128], strides = [1, 1]} : vector<16x128xf32> to vector<1x128xf32>
      %32 = vector.extract_strided_slice %2 {offsets = [3, 0], sizes = [1, 128], strides = [1, 1]} : vector<16x128xf32> to vector<1x128xf32>
      %33 = arith.subf %32, %29 : vector<1x128xf32>
      %34 = vector.extract_strided_slice %5 {offsets = [3, 0], sizes = [1, 128], strides = [1, 1]} : vector<16x128xf32> to vector<1x128xf32>
      %35 = arith.subf %34, %30 : vector<1x128xf32>
      %36 = vector.extract_strided_slice %8 {offsets = [3, 0], sizes = [1, 128], strides = [1, 1]} : vector<16x128xf32> to vector<1x128xf32>
      %37 = arith.subf %36, %31 : vector<1x128xf32>
      %38 = arith.mulf %33, %33 : vector<1x128xf32>
      %39 = arith.mulf %35, %35 : vector<1x128xf32>
      %40 = arith.addf %38, %39 : vector<1x128xf32>
      %41 = arith.mulf %37, %37 : vector<1x128xf32>
      %42 = arith.addf %40, %41 : vector<1x128xf32>
      %cst_11 = arith.constant 9.99999968E-21 : f32
      %43 = vector.broadcast %cst_11 : f32 to vector<1x128xf32>
      %44 = arith.addf %42, %43 : vector<1x128xf32>
      %45 = math.rsqrt %44 : vector<1x128xf32>
      %46 = arith.mulf %33, %45 : vector<1x128xf32>
      %47 = arith.mulf %35, %45 : vector<1x128xf32>
      %48 = arith.mulf %37, %45 : vector<1x128xf32>
      %49 = arith.mulf %46, %28 : vector<1x128xf32>
      %50 = arith.mulf %47, %28 : vector<1x128xf32>
      %51 = arith.mulf %48, %28 : vector<1x128xf32>
      %52 = vector.broadcast %29 : vector<1x128xf32> to vector<16x128xf32>
      %53 = arith.subf %2, %52 : vector<16x128xf32>
      %54 = vector.broadcast %30 : vector<1x128xf32> to vector<16x128xf32>
      %55 = arith.subf %5, %54 : vector<16x128xf32>
      %56 = vector.broadcast %31 : vector<1x128xf32> to vector<16x128xf32>
      %57 = arith.subf %8, %56 : vector<16x128xf32>
      %58 = vector.broadcast %46 : vector<1x128xf32> to vector<16x128xf32>
      %59 = arith.mulf %58, %53 : vector<16x128xf32>
      %60 = vector.broadcast %47 : vector<1x128xf32> to vector<16x128xf32>
      %61 = arith.mulf %60, %55 : vector<16x128xf32>
      %62 = arith.addf %59, %61 : vector<16x128xf32>
      %63 = vector.broadcast %48 : vector<1x128xf32> to vector<16x128xf32>
      %64 = arith.mulf %63, %57 : vector<16x128xf32>
      %65 = arith.addf %62, %64 : vector<16x128xf32>
      %66 = vector.broadcast %47 : vector<1x128xf32> to vector<16x128xf32>
      %67 = arith.mulf %66, %57 : vector<16x128xf32>
      %68 = vector.broadcast %48 : vector<1x128xf32> to vector<16x128xf32>
      %69 = arith.mulf %68, %55 : vector<16x128xf32>
      %70 = arith.subf %67, %69 : vector<16x128xf32>
      %71 = vector.broadcast %48 : vector<1x128xf32> to vector<16x128xf32>
      %72 = arith.mulf %71, %53 : vector<16x128xf32>
      %73 = vector.broadcast %46 : vector<1x128xf32> to vector<16x128xf32>
      %74 = arith.mulf %73, %57 : vector<16x128xf32>
      %75 = arith.subf %72, %74 : vector<16x128xf32>
      %76 = vector.broadcast %46 : vector<1x128xf32> to vector<16x128xf32>
      %77 = arith.mulf %76, %55 : vector<16x128xf32>
      %78 = vector.broadcast %47 : vector<1x128xf32> to vector<16x128xf32>
      %79 = arith.mulf %78, %53 : vector<16x128xf32>
      %80 = arith.subf %77, %79 : vector<16x128xf32>
      %81 = vector.broadcast %25 : vector<1x128xf32> to vector<16x128xf32>
      %82 = arith.mulf %53, %81 : vector<16x128xf32>
      %83 = vector.broadcast %26 : vector<1x128xf32> to vector<16x128xf32>
      %84 = arith.mulf %70, %83 : vector<16x128xf32>
      %85 = arith.addf %82, %84 : vector<16x128xf32>
      %86 = vector.broadcast %49 : vector<1x128xf32> to vector<16x128xf32>
      %87 = arith.mulf %86, %65 : vector<16x128xf32>
      %88 = arith.addf %85, %87 : vector<16x128xf32>
      %89 = vector.broadcast %29 : vector<1x128xf32> to vector<16x128xf32>
      %90 = arith.addf %88, %89 : vector<16x128xf32>
      %91 = vector.broadcast %25 : vector<1x128xf32> to vector<16x128xf32>
      %92 = arith.mulf %55, %91 : vector<16x128xf32>
      %93 = vector.broadcast %26 : vector<1x128xf32> to vector<16x128xf32>
      %94 = arith.mulf %75, %93 : vector<16x128xf32>
      %95 = arith.addf %92, %94 : vector<16x128xf32>
      %96 = vector.broadcast %50 : vector<1x128xf32> to vector<16x128xf32>
      %97 = arith.mulf %96, %65 : vector<16x128xf32>
      %98 = arith.addf %95, %97 : vector<16x128xf32>
      %99 = vector.broadcast %30 : vector<1x128xf32> to vector<16x128xf32>
      %100 = arith.addf %98, %99 : vector<16x128xf32>
      %101 = vector.broadcast %25 : vector<1x128xf32> to vector<16x128xf32>
      %102 = arith.mulf %57, %101 : vector<16x128xf32>
      %103 = vector.broadcast %26 : vector<1x128xf32> to vector<16x128xf32>
      %104 = arith.mulf %80, %103 : vector<16x128xf32>
      %105 = arith.addf %102, %104 : vector<16x128xf32>
      %106 = vector.broadcast %51 : vector<1x128xf32> to vector<16x128xf32>
      %107 = arith.mulf %106, %65 : vector<16x128xf32>
      %108 = arith.addf %105, %107 : vector<16x128xf32>
      %109 = vector.broadcast %31 : vector<1x128xf32> to vector<16x128xf32>
      %110 = arith.addf %108, %109 : vector<16x128xf32>
      %cst_12 = arith.constant 0.000000e+00 : f32
      %111 = vector.broadcast %cst_12 : f32 to vector<16x128xf32>
      %112 = arith.cmpf one, %11, %111 : vector<16x128xf32>
      %113 = arith.select %112, %90, %2 : vector<16x128xi1>, vector<16x128xf32>
      %114 = arith.select %112, %100, %5 : vector<16x128xi1>, vector<16x128xf32>
      %115 = arith.select %112, %110, %8 : vector<16x128xi1>, vector<16x128xf32>
      %116 = vector.extract_strided_slice %23 {offsets = [1, 0], sizes = [1, 128], strides = [1, 1]} : vector<2x128xf32> to vector<1x128xf32>
      %117 = vector.extract_strided_slice %24 {offsets = [1, 0], sizes = [1, 128], strides = [1, 1]} : vector<2x128xf32> to vector<1x128xf32>
      %cst_13 = arith.constant 1.000000e+00 : f32
      %118 = vector.broadcast %cst_13 : f32 to vector<1x128xf32>
      %119 = arith.subf %118, %116 : vector<1x128xf32>
      %120 = vector.extract_strided_slice %113 {offsets = [5, 0], sizes = [1, 128], strides = [1, 1]} : vector<16x128xf32> to vector<1x128xf32>
      %121 = vector.extract_strided_slice %114 {offsets = [5, 0], sizes = [1, 128], strides = [1, 1]} : vector<16x128xf32> to vector<1x128xf32>
      %122 = vector.extract_strided_slice %115 {offsets = [5, 0], sizes = [1, 128], strides = [1, 1]} : vector<16x128xf32> to vector<1x128xf32>
      %123 = vector.extract_strided_slice %113 {offsets = [6, 0], sizes = [1, 128], strides = [1, 1]} : vector<16x128xf32> to vector<1x128xf32>
      %124 = arith.subf %123, %120 : vector<1x128xf32>
      %125 = vector.extract_strided_slice %114 {offsets = [6, 0], sizes = [1, 128], strides = [1, 1]} : vector<16x128xf32> to vector<1x128xf32>
      %126 = arith.subf %125, %121 : vector<1x128xf32>
      %127 = vector.extract_strided_slice %115 {offsets = [6, 0], sizes = [1, 128], strides = [1, 1]} : vector<16x128xf32> to vector<1x128xf32>
      %128 = arith.subf %127, %122 : vector<1x128xf32>
      %129 = arith.mulf %124, %124 : vector<1x128xf32>
      %130 = arith.mulf %126, %126 : vector<1x128xf32>
      %131 = arith.addf %129, %130 : vector<1x128xf32>
      %132 = arith.mulf %128, %128 : vector<1x128xf32>
      %133 = arith.addf %131, %132 : vector<1x128xf32>
      %cst_14 = arith.constant 9.99999968E-21 : f32
      %134 = vector.broadcast %cst_14 : f32 to vector<1x128xf32>
      %135 = arith.addf %133, %134 : vector<1x128xf32>
      %136 = math.rsqrt %135 : vector<1x128xf32>
      %137 = arith.mulf %124, %136 : vector<1x128xf32>
      %138 = arith.mulf %126, %136 : vector<1x128xf32>
      %139 = arith.mulf %128, %136 : vector<1x128xf32>
      %140 = arith.mulf %137, %119 : vector<1x128xf32>
      %141 = arith.mulf %138, %119 : vector<1x128xf32>
      %142 = arith.mulf %139, %119 : vector<1x128xf32>
      %143 = vector.broadcast %120 : vector<1x128xf32> to vector<16x128xf32>
      %144 = arith.subf %113, %143 : vector<16x128xf32>
      %145 = vector.broadcast %121 : vector<1x128xf32> to vector<16x128xf32>
      %146 = arith.subf %114, %145 : vector<16x128xf32>
      %147 = vector.broadcast %122 : vector<1x128xf32> to vector<16x128xf32>
      %148 = arith.subf %115, %147 : vector<16x128xf32>
      %149 = vector.broadcast %137 : vector<1x128xf32> to vector<16x128xf32>
      %150 = arith.mulf %149, %144 : vector<16x128xf32>
      %151 = vector.broadcast %138 : vector<1x128xf32> to vector<16x128xf32>
      %152 = arith.mulf %151, %146 : vector<16x128xf32>
      %153 = arith.addf %150, %152 : vector<16x128xf32>
      %154 = vector.broadcast %139 : vector<1x128xf32> to vector<16x128xf32>
      %155 = arith.mulf %154, %148 : vector<16x128xf32>
      %156 = arith.addf %153, %155 : vector<16x128xf32>
      %157 = vector.broadcast %138 : vector<1x128xf32> to vector<16x128xf32>
      %158 = arith.mulf %157, %148 : vector<16x128xf32>
      %159 = vector.broadcast %139 : vector<1x128xf32> to vector<16x128xf32>
      %160 = arith.mulf %159, %146 : vector<16x128xf32>
      %161 = arith.subf %158, %160 : vector<16x128xf32>
      %162 = vector.broadcast %139 : vector<1x128xf32> to vector<16x128xf32>
      %163 = arith.mulf %162, %144 : vector<16x128xf32>
      %164 = vector.broadcast %137 : vector<1x128xf32> to vector<16x128xf32>
      %165 = arith.mulf %164, %148 : vector<16x128xf32>
      %166 = arith.subf %163, %165 : vector<16x128xf32>
      %167 = vector.broadcast %137 : vector<1x128xf32> to vector<16x128xf32>
      %168 = arith.mulf %167, %146 : vector<16x128xf32>
      %169 = vector.broadcast %138 : vector<1x128xf32> to vector<16x128xf32>
      %170 = arith.mulf %169, %144 : vector<16x128xf32>
      %171 = arith.subf %168, %170 : vector<16x128xf32>
      %172 = vector.broadcast %116 : vector<1x128xf32> to vector<16x128xf32>
      %173 = arith.mulf %144, %172 : vector<16x128xf32>
      %174 = vector.broadcast %117 : vector<1x128xf32> to vector<16x128xf32>
      %175 = arith.mulf %161, %174 : vector<16x128xf32>
      %176 = arith.addf %173, %175 : vector<16x128xf32>
      %177 = vector.broadcast %140 : vector<1x128xf32> to vector<16x128xf32>
      %178 = arith.mulf %177, %156 : vector<16x128xf32>
      %179 = arith.addf %176, %178 : vector<16x128xf32>
      %180 = vector.broadcast %120 : vector<1x128xf32> to vector<16x128xf32>
      %181 = arith.addf %179, %180 : vector<16x128xf32>
      %182 = vector.broadcast %116 : vector<1x128xf32> to vector<16x128xf32>
      %183 = arith.mulf %146, %182 : vector<16x128xf32>
      %184 = vector.broadcast %117 : vector<1x128xf32> to vector<16x128xf32>
      %185 = arith.mulf %166, %184 : vector<16x128xf32>
      %186 = arith.addf %183, %185 : vector<16x128xf32>
      %187 = vector.broadcast %141 : vector<1x128xf32> to vector<16x128xf32>
      %188 = arith.mulf %187, %156 : vector<16x128xf32>
      %189 = arith.addf %186, %188 : vector<16x128xf32>
      %190 = vector.broadcast %121 : vector<1x128xf32> to vector<16x128xf32>
      %191 = arith.addf %189, %190 : vector<16x128xf32>
      %192 = vector.broadcast %116 : vector<1x128xf32> to vector<16x128xf32>
      %193 = arith.mulf %148, %192 : vector<16x128xf32>
      %194 = vector.broadcast %117 : vector<1x128xf32> to vector<16x128xf32>
      %195 = arith.mulf %171, %194 : vector<16x128xf32>
      %196 = arith.addf %193, %195 : vector<16x128xf32>
      %197 = vector.broadcast %142 : vector<1x128xf32> to vector<16x128xf32>
      %198 = arith.mulf %197, %156 : vector<16x128xf32>
      %199 = arith.addf %196, %198 : vector<16x128xf32>
      %200 = vector.broadcast %122 : vector<1x128xf32> to vector<16x128xf32>
      %201 = arith.addf %199, %200 : vector<16x128xf32>
      %cst_15 = arith.constant 0.000000e+00 : f32
      %202 = vector.broadcast %cst_15 : f32 to vector<16x128xf32>
      %203 = arith.cmpf one, %14, %202 : vector<16x128xf32>
      %204 = arith.select %203, %181, %113 : vector<16x128xi1>, vector<16x128xf32>
      %205 = arith.select %203, %191, %114 : vector<16x128xi1>, vector<16x128xf32>
      %206 = arith.select %203, %201, %115 : vector<16x128xi1>, vector<16x128xf32>
      %207 = vector.extract_strided_slice %21 {offsets = [3, 0], sizes = [3, 128], strides = [1, 1]} : vector<8x128xf32> to vector<3x128xf32>
      %cst_16 = arith.constant 5.000000e-01 : f32
      %208 = vector.broadcast %cst_16 : f32 to vector<3x128xf32>
      %209 = arith.mulf %207, %208 : vector<3x128xf32>
      %210 = math.cos %209 : vector<3x128xf32>
      %211 = math.sin %209 : vector<3x128xf32>
      %212 = vector.extract_strided_slice %210 {offsets = [0, 0], sizes = [1, 128], strides = [1, 1]} : vector<3x128xf32> to vector<1x128xf32>
      %213 = vector.extract_strided_slice %210 {offsets = [1, 0], sizes = [1, 128], strides = [1, 1]} : vector<3x128xf32> to vector<1x128xf32>
      %214 = vector.extract_strided_slice %210 {offsets = [2, 0], sizes = [1, 128], strides = [1, 1]} : vector<3x128xf32> to vector<1x128xf32>
      %215 = vector.extract_strided_slice %211 {offsets = [0, 0], sizes = [1, 128], strides = [1, 1]} : vector<3x128xf32> to vector<1x128xf32>
      %216 = vector.extract_strided_slice %211 {offsets = [1, 0], sizes = [1, 128], strides = [1, 1]} : vector<3x128xf32> to vector<1x128xf32>
      %217 = vector.extract_strided_slice %211 {offsets = [2, 0], sizes = [1, 128], strides = [1, 1]} : vector<3x128xf32> to vector<1x128xf32>
      %218 = arith.mulf %212, %213 : vector<1x128xf32>
      %219 = arith.mulf %218, %214 : vector<1x128xf32>
      %220 = arith.mulf %215, %216 : vector<1x128xf32>
      %221 = arith.mulf %220, %217 : vector<1x128xf32>
      %222 = arith.addf %219, %221 : vector<1x128xf32>
      %223 = arith.mulf %215, %213 : vector<1x128xf32>
      %224 = arith.mulf %223, %214 : vector<1x128xf32>
      %225 = arith.mulf %212, %216 : vector<1x128xf32>
      %226 = arith.mulf %225, %217 : vector<1x128xf32>
      %227 = arith.subf %224, %226 : vector<1x128xf32>
      %228 = arith.mulf %212, %216 : vector<1x128xf32>
      %229 = arith.mulf %228, %214 : vector<1x128xf32>
      %230 = arith.mulf %215, %213 : vector<1x128xf32>
      %231 = arith.mulf %230, %217 : vector<1x128xf32>
      %232 = arith.addf %229, %231 : vector<1x128xf32>
      %233 = arith.mulf %212, %213 : vector<1x128xf32>
      %234 = arith.mulf %233, %217 : vector<1x128xf32>
      %235 = arith.mulf %215, %216 : vector<1x128xf32>
      %236 = arith.mulf %235, %214 : vector<1x128xf32>
      %237 = arith.subf %234, %236 : vector<1x128xf32>
      %cst_17 = arith.constant 2.000000e+00 : f32
      %238 = vector.broadcast %cst_17 : f32 to vector<1x128xf32>
      %239 = arith.mulf %238, %227 : vector<1x128xf32>
      %240 = arith.mulf %239, %227 : vector<1x128xf32>
      %cst_18 = arith.constant 2.000000e+00 : f32
      %241 = vector.broadcast %cst_18 : f32 to vector<1x128xf32>
      %242 = arith.mulf %241, %232 : vector<1x128xf32>
      %243 = arith.mulf %242, %232 : vector<1x128xf32>
      %cst_19 = arith.constant 2.000000e+00 : f32
      %244 = vector.broadcast %cst_19 : f32 to vector<1x128xf32>
      %245 = arith.mulf %244, %237 : vector<1x128xf32>
      %246 = arith.mulf %245, %237 : vector<1x128xf32>
      %cst_20 = arith.constant 2.000000e+00 : f32
      %247 = vector.broadcast %cst_20 : f32 to vector<1x128xf32>
      %248 = arith.mulf %247, %227 : vector<1x128xf32>
      %249 = arith.mulf %248, %232 : vector<1x128xf32>
      %cst_21 = arith.constant 2.000000e+00 : f32
      %250 = vector.broadcast %cst_21 : f32 to vector<1x128xf32>
      %251 = arith.mulf %250, %227 : vector<1x128xf32>
      %252 = arith.mulf %251, %237 : vector<1x128xf32>
      %cst_22 = arith.constant 2.000000e+00 : f32
      %253 = vector.broadcast %cst_22 : f32 to vector<1x128xf32>
      %254 = arith.mulf %253, %232 : vector<1x128xf32>
      %255 = arith.mulf %254, %237 : vector<1x128xf32>
      %cst_23 = arith.constant 2.000000e+00 : f32
      %256 = vector.broadcast %cst_23 : f32 to vector<1x128xf32>
      %257 = arith.mulf %256, %227 : vector<1x128xf32>
      %258 = arith.mulf %257, %222 : vector<1x128xf32>
      %cst_24 = arith.constant 2.000000e+00 : f32
      %259 = vector.broadcast %cst_24 : f32 to vector<1x128xf32>
      %260 = arith.mulf %259, %232 : vector<1x128xf32>
      %261 = arith.mulf %260, %222 : vector<1x128xf32>
      %cst_25 = arith.constant 2.000000e+00 : f32
      %262 = vector.broadcast %cst_25 : f32 to vector<1x128xf32>
      %263 = arith.mulf %262, %237 : vector<1x128xf32>
      %264 = arith.mulf %263, %222 : vector<1x128xf32>
      %cst_26 = arith.constant 1.000000e+00 : f32
      %265 = vector.broadcast %cst_26 : f32 to vector<1x128xf32>
      %266 = arith.subf %265, %243 : vector<1x128xf32>
      %267 = arith.subf %266, %246 : vector<1x128xf32>
      %268 = arith.subf %249, %264 : vector<1x128xf32>
      %269 = arith.addf %252, %261 : vector<1x128xf32>
      %270 = arith.addf %249, %264 : vector<1x128xf32>
      %cst_27 = arith.constant 1.000000e+00 : f32
      %271 = vector.broadcast %cst_27 : f32 to vector<1x128xf32>
      %272 = arith.subf %271, %240 : vector<1x128xf32>
      %273 = arith.subf %272, %246 : vector<1x128xf32>
      %274 = arith.subf %255, %258 : vector<1x128xf32>
      %275 = arith.subf %252, %261 : vector<1x128xf32>
      %276 = arith.addf %255, %258 : vector<1x128xf32>
      %cst_28 = arith.constant 1.000000e+00 : f32
      %277 = vector.broadcast %cst_28 : f32 to vector<1x128xf32>
      %278 = arith.subf %277, %240 : vector<1x128xf32>
      %279 = arith.subf %278, %243 : vector<1x128xf32>
      %280 = vector.extract_strided_slice %21 {offsets = [0, 0], sizes = [1, 128], strides = [1, 1]} : vector<8x128xf32> to vector<1x128xf32>
      %281 = vector.extract_strided_slice %21 {offsets = [1, 0], sizes = [1, 128], strides = [1, 1]} : vector<8x128xf32> to vector<1x128xf32>
      %282 = vector.extract_strided_slice %21 {offsets = [2, 0], sizes = [1, 128], strides = [1, 1]} : vector<8x128xf32> to vector<1x128xf32>
      %283 = vector.broadcast %267 : vector<1x128xf32> to vector<16x128xf32>
      %284 = arith.mulf %283, %204 : vector<16x128xf32>
      %285 = vector.broadcast %268 : vector<1x128xf32> to vector<16x128xf32>
      %286 = arith.mulf %285, %205 : vector<16x128xf32>
      %287 = arith.addf %284, %286 : vector<16x128xf32>
      %288 = vector.broadcast %269 : vector<1x128xf32> to vector<16x128xf32>
      %289 = arith.mulf %288, %206 : vector<16x128xf32>
      %290 = arith.addf %287, %289 : vector<16x128xf32>
      %291 = vector.broadcast %280 : vector<1x128xf32> to vector<16x128xf32>
      %292 = arith.addf %290, %291 : vector<16x128xf32>
      %c0_29 = arith.constant 0 : index
      %c0_30 = arith.constant 0 : index
      %293 = arith.index_cast %19 : i32 to index
      %294 = vector.load %arg4[%c0_29, %c0_30, %293] : memref<3x16x512xf32, #tpu.memory_space<vmem>>, vector<1x16x128xf32>
      %295 = vector.shape_cast %294 : vector<1x16x128xf32> to vector<16x128xf32>
      %296 = vector.shape_cast %292 : vector<16x128xf32> to vector<1x16x128xf32>
      tpu.vector_store %arg4[%c0_29, %c0_30, %293], %296 {strides = array<i32>} : memref<3x16x512xf32, #tpu.memory_space<vmem>>, vector<1x16x128xf32>,
      %297 = vector.broadcast %270 : vector<1x128xf32> to vector<16x128xf32>
      %298 = arith.mulf %297, %204 : vector<16x128xf32>
      %299 = vector.broadcast %273 : vector<1x128xf32> to vector<16x128xf32>
      %300 = arith.mulf %299, %205 : vector<16x128xf32>
      %301 = arith.addf %298, %300 : vector<16x128xf32>
      %302 = vector.broadcast %274 : vector<1x128xf32> to vector<16x128xf32>
      %303 = arith.mulf %302, %206 : vector<16x128xf32>
      %304 = arith.addf %301, %303 : vector<16x128xf32>
      %305 = vector.broadcast %281 : vector<1x128xf32> to vector<16x128xf32>
      %306 = arith.addf %304, %305 : vector<16x128xf32>
      %c1_31 = arith.constant 1 : index
      %c0_32 = arith.constant 0 : index
      %307 = arith.index_cast %19 : i32 to index
      %308 = vector.load %arg4[%c1_31, %c0_32, %307] : memref<3x16x512xf32, #tpu.memory_space<vmem>>, vector<1x16x128xf32>
      %309 = vector.shape_cast %308 : vector<1x16x128xf32> to vector<16x128xf32>
      %310 = vector.shape_cast %306 : vector<16x128xf32> to vector<1x16x128xf32>
      tpu.vector_store %arg4[%c1_31, %c0_32, %307], %310 {strides = array<i32>} : memref<3x16x512xf32, #tpu.memory_space<vmem>>, vector<1x16x128xf32>,
      %311 = vector.broadcast %275 : vector<1x128xf32> to vector<16x128xf32>
      %312 = arith.mulf %311, %204 : vector<16x128xf32>
      %313 = vector.broadcast %276 : vector<1x128xf32> to vector<16x128xf32>
      %314 = arith.mulf %313, %205 : vector<16x128xf32>
      %315 = arith.addf %312, %314 : vector<16x128xf32>
      %316 = vector.broadcast %279 : vector<1x128xf32> to vector<16x128xf32>
      %317 = arith.mulf %316, %206 : vector<16x128xf32>
      %318 = arith.addf %315, %317 : vector<16x128xf32>
      %319 = vector.broadcast %282 : vector<1x128xf32> to vector<16x128xf32>
      %320 = arith.addf %318, %319 : vector<16x128xf32>
      %c2_33 = arith.constant 2 : index
      %c0_34 = arith.constant 0 : index
      %321 = arith.index_cast %19 : i32 to index
      %322 = vector.load %arg4[%c2_33, %c0_34, %321] : memref<3x16x512xf32, #tpu.memory_space<vmem>>, vector<1x16x128xf32>
      %323 = vector.shape_cast %322 : vector<1x16x128xf32> to vector<16x128xf32>
      %324 = vector.shape_cast %320 : vector<16x128xf32> to vector<1x16x128xf32>
      tpu.vector_store %arg4[%c2_33, %c0_34, %321], %324 {strides = array<i32>} : memref<3x16x512xf32, #tpu.memory_space<vmem>>, vector<1x16x128xf32>,
    }
    %c4_i32_7 = arith.constant 4 : i32
    return
  }
  func.func @transform_0(%arg0: i32) -> (i32, i32) {
    %c0_i32 = arith.constant 0 : i32
    %c0_i32_0 = arith.constant 0 : i32
    return %c0_i32, %arg0 : i32, i32
  }
  func.func @transform_1(%arg0: i32) -> (i32, i32) {
    %c0_i32 = arith.constant 0 : i32
    %c0_i32_0 = arith.constant 0 : i32
    %c0_i32_1 = arith.constant 0 : i32
    return %c0_i32, %c0_i32_0 : i32, i32
  }
  func.func @transform_2(%arg0: i32) -> (i32, i32) {
    %c0_i32 = arith.constant 0 : i32
    %c0_i32_0 = arith.constant 0 : i32
    %c0_i32_1 = arith.constant 0 : i32
    return %c0_i32, %c0_i32_0 : i32, i32
  }
  func.func @transform_3(%arg0: i32) -> (i32, i32, i32) {
    %c0_i32 = arith.constant 0 : i32
    %c0_i32_0 = arith.constant 0 : i32
    %c0_i32_1 = arith.constant 0 : i32
    return %c0_i32, %c0_i32_0, %arg0 : i32, i32, i32
  }
}

</mosaic_0001>

<bundles_post_ra>
// kernel: drug_conformation_forward.1
= control target key start
LH: loop header
LB: loop body
LE: loop exit
PB: predicated region body
PF: predicated region fallthrough
CT: control target
= control target key end

     0   :  { %s1515_s12 = smov 0   ;;  %s1517_s13 = smov 0   ;;  %s2163_s0 = inlined_call_operand.vmem [shape: f32[8,1024], index: 0, kind: input, shape index: {}]   ;;  %s2164_s1 = inlined_call_operand.vmem [shape: f32[16,3], index: 1, kind: input, shape index: {}]   ;;  %s2165_s2 = inlined_call_operand.vmem [shape: f32[16,2], index: 2, kind: input, shape index: {}]   ;;  %s2166_s3 = inlined_call_operand.vmem [shape: f32[3,16,1024], index: 3, kind: output, shape index: {}]  }
   0x1   :  { %s1519_s14 = smov 0  }
   0x2 LB: > { %s1528_s15 = sadd.s32 4294967295, %s1477_s14   ;;  %s1530_s16 = sadd.s32 1, %s1477_s14   ;;  %s1477_s14 = sphi %s1519_s14, %s2220_s14   ;;  %s1473_s13 = sphi %s1517_s13, %s2219_s13   ;;  %s1469_s12 = sphi %s1515_s12, %s2218_s12  }
   0x3   : > { %s85_s17 = ssub.s32 %s1477_s14, %s1530_s16  ;;  %s88_s18 = sadd.s32 1, %s1473_s13 }
   0x4   : > { %p86_p0 = scmp.eq.s32.totalorder %s85_s17, 0  ;;  %p98_p1 = scmp.ne.s32.totalorder %s1473_s13, %s1469_s12 }
   0x5   : > { %p99_p2 = scmp.eq.s32.totalorder %s1528_s15, 1  ;;  %p1360_p3 = scmp.ge.s32.totalorder %s1477_s14, 1 }
   0x6   : > { %s1538_s19 = scalar_select %p86_p0, %s1473_s13, %s88_s18  }
   0x7   : > { %p1540_p4 = por %p99_p2, %p98_p1  ;;  %p138_p5 = scmp.lt.s32.totalorder %s1477_s14, 3 }
   0x9   : > { %p139_p6 = pnand %p1360_p3, %p138_p5 }
   0xb   : > { %142 = sbr.rel (%p139_p6) target bundleno = 469 (0x1d5), region = 32 }
  0x10   : > { %v1547_v0 = vld [vmem:[%s2164_s1] sm:$0xff]  ;;  %v1483_v1 = vmov 1   ;;  %v1484_v2 = vmov 0   ;;  %v1485_v3 = vmov 2   ;;  %v169_v4 = vld [vmem:[%s2164_s1 + $0x8] sm:$0xff]  ;;  %s1361_s25 = sshll.u32 %s1528_s15, 2 }
  0x11   : > { %2184 = vst [vmem:[#allocation3_spill] sm:$0xff] %v1547_v0  ;;  %1441 = vset.pattern.permute.xlu1 %v1483_v1  ;;  %1440 = vset.pattern.permute.xlu0 %v1484_v2  ;;  %p162_p7 = scmp.lt.s32.totalorder %s1361_s25, 7  ;;  %s158_s26 = sand.u32 1, %s1469_s12   ;;  %v196_v5 = vld [vmem:[%s2165_s2] sm:$0xff]  ;;  %v197_v6 = vld [vmem:[%s2165_s2 + $0x8] sm:$0xff] }
  0x12   : > { %181 = vperm.xlu1 %1441, %v1547_v0   ;;  %172 = vperm.xlu0 %1440, %v1547_v0   ;;  %s1389_s27 = smul.u32 192, %s158_s26  ;;  %s1590_s10 = smov 0  }
  0x13   : > { %1442 = vset.pattern.permute.xlu2 %v1485_v3  ;;  %s2222_s25 = smov (!%p162_p7, %s1361_s25), 7 }
  0x14   : > { %189 = vperm.xlu2 %1442, %v1547_v0   ;;  %s1362_s28 = sshll.u32 %s2222_s25, 3  ;;  %s1588_s9 = scalar_lea.vmem [#allocation2], %s1389_s27 }
  0x15   : > { %s1563_s6 = scalar_lea.vmem %s2163_s0, %s1362_s28 }
  0x1a   : > { %185 = vperm.xlu1 %1441, %v169_v4   ;;  %177 = vperm.xlu0 %1440, %v169_v4  }
  0x1c   : > { %193 = vperm.xlu2 %1442, %v169_v4  }
  0x22   : > { %200 = vperm.xlu0 %1440, %v196_v5   ;;  %1443 = vset.pattern.permute.xlu1 %v1484_v2 }
  0x23   : > { %205 = vperm.xlu1 %1443, %v197_v6  }
  0x24   : > { %1444 = vset.pattern.permute.xlu2 %v1483_v1 }
  0x25   : > { %209 = vperm.xlu2 %1444, %v196_v5  }
  0x2a   : > { %1445 = vset.pattern.permute.xlu0 %v1483_v1 }
  0x2b   : > { %213 = vperm.xlu0 %1445, %v197_v6  }
  0x6e   : > { %v1568_v7 = vpop.permute.xlu2 %189 }
  0x6f   : > { %2185 = vst [vmem:[#allocation4_spill] sm:$0xff] %v1568_v7 }
  0x76   : > { %v1570_v8 = vpop.permute.xlu2 %193 }
  0x77   : > { %2186 = vst [vmem:[#allocation5_spill] sm:$0xff] %v1570_v8 }
  0x7f   : > { %v1572_v9 = vpop.permute.xlu2 %209 }
  0x84   : > { %v1574_v10 = vpop.permute.xlu1 %181  ;;  %v1576_v11 = vpop.permute.xlu0 %172 }
  0x85   : > { %2187 = vst [vmem:[#allocation6_spill] sm:$0xff] %v1574_v10 }
  0x86   : > { %2188 = vst [vmem:[#allocation7_spill] sm:$0xff] %v1576_v11 }
  0x8c   : > { %v1578_v12 = vpop.permute.xlu1 %185  ;;  %v1580_v13 = vpop.permute.xlu0 %177 }
  0x8d   : > { %2189 = vst [vmem:[#allocation8_spill] sm:$0xff] %v1578_v12 }
  0x8e   : > { %2190 = vst [vmem:[#allocation9_spill] sm:$0xff] %v1580_v13 }
  0x94   : > { %v1582_v14 = vpop.permute.xlu0 %200 }
  0x95   : > { %2191 = vst [vmem:[#allocation10_spill] sm:$0xff] %v1582_v14  ;;  %v1584_v15 = vpop.permute.xlu1 %205 }
  0x96   : > { %2192 = vst [vmem:[#allocation11_spill] sm:$0xff] %v1584_v15 }
  0x9d   : > { %v1586_v16 = vpop.permute.xlu0 %213 }
  0x9e LB: >> { %v2193_v15 = vld [vmem:[#allocation11_spill] sm:$0xff]  ;;  %v2194_v13 = vld [vmem:[#allocation9_spill] sm:$0xff]  ;;  %v2195_v12 = vld [vmem:[#allocation8_spill] sm:$0xff]  ;;  %s1486_s11 = smov 127   ;;  %s1487_s12 = smov 126   ;;  %s1481_s10 = sphi %s1590_s10, %s221_s10  }
  0x9f   : >> { %v2196_v11 = vld [vmem:[#allocation7_spill] sm:$0xff]  ;;  %v2197_v10 = vld [vmem:[#allocation6_spill] sm:$0xff]  ;;  %v2198_v8 = vld [vmem:[#allocation5_spill] sm:$0xff]  ;;  %s1363_s14 = sshll.u32 %s1481_s10, 7  ;;  %v1488_v27 = vmov 2102212464  }
  0xa0   : >> { %v2199_v7 = vld [vmem:[#allocation4_spill] sm:$0xff]  ;;  %v2200_v0 = vld [vmem:[#allocation3_spill] sm:$0xff]  ;;  %s1597_s17 = sshra.s32 %s1363_s14, 7  ;;  %v1489_v31 = vmov 683565275   ;;  %v2203_v14 = vld [vmem:[#allocation10_spill] sm:$0xff] }
  0xa1   : >> { %v572_v17 = vrot.slane %v2200_v0, 2  ;;  %s1364_s18 = sshll.u32 %s1597_s17, 3  ;;  %v1490_v33 = vmov 2475754826   ;;  %v1491_v36 = vmov 2131351028  }
  0xa2   : >> { %s1603_s21 = scalar_lea.vmem %s1563_s6, %s1364_s18  ;;  %v1492_v42 = vmov 920167782   ;;  %v1493_v48 = vmov 1326507024   ;;  %s1173_s25 = scalar_lea.vmem %s1588_s9, %s1364_s18 [#allocation2] }
  0xa3   : >> { %578 = vrot.lane.b32.xlu0 %v572_v17, %s1486_s11  ;;  %1390 = vpush %v572_v17  ;;  %v1606_v18 = vld [vmem:[%s1603_s21] sm:$0xff]  ;;  %s221_s10 = sadd.s32 1, %s1481_s10  }
  0xa4   : >> { %v231_v19 = vand.u32 2139095040, %v1606_v18  ;;  %v228_v26 = vand.u32 2147483647, %v1606_v18  ;;  %vm230_vm13 = vcmp.lt.s32.totalorder %v1606_v18, 0  ;;  %p218_p8 = scmp.ge.s32.totalorder %s221_s10, 4  }
  0xa6   : >> { %v232_v20 = vshrl.u32 %v231_v19, 23  ;;  %v235_v29 = vand.u32 8388607, %v228_v26  ;;  %vm1691_vm14 = vcmp.le.f32.partialorder %v228_v26, 0.7853982 }
  0xa8   : >> { %v1365_v21 = vadd.s32 4294967169, %v232_v20  ;;  %v236_v40 = vor.u32 8388608, %v235_v29 }
  0xaa   : >> { %v238_v22 = vadd.s32 1, %v1365_v21  ;;  %v276_v51 = vshll.u32 %v236_v40, 8 }
  0xab   : >> { %585 = vrot.lane.b32.xlu0 %v572_v17, %s1487_s12 }
  0xac   : >> { %vm239_vm0 = vcmp.gt.s32.totalorder %v238_v22, 0  ;;  %v277_v56 = vand.u32 65535, %v276_v51  ;;  %v278_v59 = vshrl.u32 %v276_v51, 16 }
  0xad   : >> { %v240_v23 = vsel %vm239_vm0, %v238_v22, 0 }
  0xae   : >> { %v242_v24 = vand.u32 31, %v240_v23  ;;  %v1615_v30 = vshrl.u32 %v240_v23, 5 }
  0xb0   : >> { %v1609_v25 = vsub.s32 32, %v242_v24  ;;  %v254_v28 = vshll.u32 %v1488_v27, %v242_v24  ;;  %v245_v32 = vshll.u32 %v1489_v31, %v242_v24  ;;  %v248_v35 = vshll.u32 %v1490_v33, %v242_v24 }
  0xb1   : >> { %v251_v38 = vshll.u32 %v1491_v36, %v242_v24  ;;  %v257_v44 = vshll.u32 %v1492_v42, %v242_v24  ;;  %vm260_vm1 = vcmp.lt.s32.totalorder %v1615_v30, 1  ;;  %vm262_vm2 = vcmp.lt.s32.totalorder %v1615_v30, 3 }
  0xb2   : >> { %v246_v34 = vshrl.u32 %v1490_v33, %v1609_v25  ;;  %v249_v37 = vshrl.u32 %v1491_v36, %v1609_v25  ;;  %v252_v39 = vshrl.u32 %v1488_v27, %v1609_v25  ;;  %v255_v43 = vshrl.u32 %v1492_v42, %v1609_v25 }
  0xb3   : >> { %v258_v49 = vshrl.u32 %v1493_v48, %v1609_v25  ;;  %vm261_vm3 = vcmp.lt.s32.totalorder %v1615_v30, 2  ;;  %vm263_vm4 = vcmp.lt.s32.totalorder %v1615_v30, 4 }
  0xb4   : >> { %v247_v41 = vor.u32 %v246_v34, %v245_v32  ;;  %v250_v45 = vor.u32 %v249_v37, %v248_v35  ;;  %v253_v46 = vor.u32 %v252_v39, %v251_v38  ;;  %v256_v47 = vor.u32 %v255_v43, %v254_v28 }
  0xb5   : >> { %v259_v52 = vor.u32 %v258_v49, %v257_v44  ;;  %v1494_v34 = vmov 0   ;;  %v244_v39 = vshrl.u32 %v1489_v31, %v1609_v25 }
  0xb6   : >> { %v268_v50 = vsel %vm260_vm1, %v247_v41, %v250_v45  ;;  %v269_v53 = vsel %vm263_vm4, %v256_v47, 920167782  ;;  %v272_v55 = vsel %vm260_vm1, %v250_v45, %v253_v46  ;;  %v265_v44 = vsel %vm263_vm4, %v253_v46, 2102212464 }
  0xb7   : >> { %v270_v54 = vsel %vm262_vm2, %v253_v46, %v269_v53  ;;  %v273_v58 = vsel %vm263_vm4, %v259_v52, 1326507024  ;;  %v264_v52 = vsel %vm260_vm1, %v244_v39, %v247_v41  ;;  %v266_v53 = vsel %vm262_vm2, %v250_v45, %v265_v44 }
  0xb8   : >> { %v271_v57 = vsel %vm261_vm3, %v268_v50, %v270_v54  ;;  %v274_v60 = vsel %vm262_vm2, %v256_v47, %v273_v58  ;;  %v267_v46 = vsel %vm261_vm3, %v264_v52, %v266_v53  ;;  %v544_v44 = vrot.slane %v2199_v7, 7 }
  0xb9   : >> { %v301_v61 = vand.u32 65535, %v271_v57  ;;  %v302_v62 = vshrl.u32 %v271_v57, 16  ;;  %v275_v63 = vsel %vm261_vm3, %v272_v55, %v274_v60 }
  0xba   : >> { %v279_v1 = vand.u32 65535, %v275_v63  ;;  %v280_v2 = vshrl.u32 %v275_v63, 16 }
  0xbb   : >> { %v304_v3 = vmul.u32 %v302_v62, %v277_v56  ;;  %v303_v4 = vmul.u32 %v301_v61, %v277_v56  ;;  %v305_v5 = vmul.u32 %v301_v61, %v278_v59  ;;  %v306_v20 = vmul.u32 %v302_v62, %v278_v59 }
  0xbc   : >> { %v281_v6 = vmul.u32 %v279_v1, %v277_v56  ;;  %v282_v17 = vmul.u32 %v280_v2, %v277_v56  ;;  %v283_v19 = vmul.u32 %v279_v1, %v278_v59  ;;  %v284_v23 = vmul.u32 %v280_v2, %v278_v59 }
  0xbd   : >> { %v307_v21 = vshll.u32 %v304_v3, 16  ;;  %v309_v22 = vshll.u32 %v305_v5, 16  ;;  %v308_v49 = vshrl.u32 %v304_v3, 16  ;;  %v310_v25 = vshrl.u32 %v305_v5, 16 }
  0xbe   : >> { %v285_v24 = vshll.u32 %v282_v17, 16  ;;  %v287_v28 = vshll.u32 %v283_v19, 16  ;;  %v286_v40 = vshrl.u32 %v282_v17, 16  ;;  %v288_v54 = vshrl.u32 %v283_v19, 16 }
  0xbf   : >> { %vm311_vm5 = vc.u32 %v303_v4, %v307_v21  ;;  %v313_v29 = vadd.s32 %v307_v21, %v303_v4  ;;  %v321_v62 = vmul.u32 %v276_v51, %v267_v46  ;;  %v1669_v19 = vmul.f32 0.5, %v1606_v18 }
  0xc0   : >> { %vm289_vm6 = vc.u32 %v281_v6, %v285_v24  ;;  %v291_v32 = vadd.s32 %v285_v24, %v281_v6  ;;  %v312_v35 = vsel %vm311_vm5, 1, %v1494_v34 }
  0xc1   : >> { %v290_v37 = vsel %vm289_vm6, 1, %v1494_v34  ;;  %v314_v38 = vadd.s32 %v312_v35, %v306_v20  ;;  %vm315_vm7 = vc.u32 %v313_v29, %v309_v22  ;;  %v317_v58 = vadd.s32 %v313_v29, %v309_v22 }
  0xc2   : >> { %v292_v43 = vadd.s32 %v290_v37, %v284_v23  ;;  %vm293_vm8 = vc.u32 %v291_v32, %v287_v28  ;;  %v316_v50 = vsel %vm315_vm7, 1, %v1494_v34  ;;  %v801_v21 = vand.u32 2139095040, %v1669_v19 }
  0xc3   : >> { %v294_v47 = vsel %vm293_vm8, 1, %v1494_v34  ;;  %v318_v56 = vadd.s32 %v316_v50, %v314_v38  ;;  %v538_v28 = vrot.slane %v2196_v11, 7  ;;  %v541_v35 = vrot.slane %v2197_v10, 7 }
  0xc4   : >> { %v296_v55 = vadd.s32 %v294_v47, %v292_v43  ;;  %v802_v37 = vshrl.u32 %v801_v21, 23 }
  0xc5   : >> { %v319_v59 = vadd.s32 %v318_v56, %v308_v49  ;;  %v1675_v43 = vsub.f32 %v2196_v11, %v538_v28  ;;  %v1679_v50 = vsub.f32 %v2197_v10, %v541_v35 }
  0xc6   : >> { %v297_v57 = vadd.s32 %v296_v55, %v286_v40  ;;  %v1371_v40 = vadd.s32 4294967169, %v802_v37 }
  0xc7   : >> { %v320_v61 = vadd.s32 %v319_v59, %v310_v25  ;;  %v547_v25 = vmul.f32 %v1675_v43, %v1675_v43  ;;  %v548_v56 = vmul.f32 %v1679_v50, %v1679_v50 }
  0xc8   : >> { %v298_v60 = vadd.s32 %v297_v57, %v288_v54  ;;  %v808_v52 = vadd.s32 1, %v1371_v40  ;;  %v1682_v54 = vsub.f32 %v2199_v7, %v544_v44 }
  0xc9   : >> { %v324_v63 = vadd.s32 1, %v320_v61 }
  0xca   : >> { %vm323_vm9 = vc.u32 %v298_v60, %v317_v58  ;;  %v322_v20 = vadd.s32 %v317_v58, %v298_v60  ;;  %vm809_vm12 = vcmp.gt.s32.totalorder %v808_v52, 0 }
  0xcb   : >> { %v325_v1 = vsel %vm323_vm9, %v324_v63, %v320_v61  ;;  %v810_v57 = vsel %vm809_vm12, %v808_v52, 0  ;;  %v798_v61 = vand.u32 2147483647, %v1669_v19 }
  0xcc   : >> { %v326_v41 = vadd.s32 %v325_v1, %v321_v62  ;;  %v812_v46 = vand.u32 31, %v810_v57  ;;  %v549_v1 = vadd.f32 %v548_v56, %v547_v25 }
  0xce   : >> { %v327_v2 = vadd.s32 536870912, %v326_v41  ;;  %v1696_v62 = vsub.s32 32, %v812_v46 }
  0xd0   : >> { %v1665_v3 = vshrl.u32 %v327_v2, 30  ;;  %v805_v2 = vand.u32 8388607, %v798_v61 }
  0xd2   : >> { %v329_v45 = vshll.u32 %v1665_v3, 30 }
  0xd4   : >> { %v330_v4 = vsub.s32 %v326_v41, %v329_v45  ;;  %v550_v41 = vmul.f32 %v1682_v54, %v1682_v54  ;;  %v818_v45 = vshll.u32 %v1490_v33, %v812_v46  ;;  %s1391_s22 = spop %1390 }
  0xd6   : >> { %vm331_vm10 = vcmp.lt.s32.totalorder %v330_v4, 0  ;;  %v332_v5 = vsub.s32 0, %v330_v4 }
  0xd8   : >> { %v333_v6 = vsel %vm331_vm10, %v332_v5, %v330_v4  ;;  %v1712_v5 = vshrl.u32 %v810_v57, 5 }
  0xd9   : >> { %v334_v17 = vclz %v333_v6  ;;  %v821_v6 = vshll.u32 %v1491_v36, %v812_v46 }
  0xda   : >> { %vm830_vm15 = vcmp.lt.s32.totalorder %v1712_v5, 1  ;;  %vm833_vm0 = vcmp.lt.s32.totalorder %v1712_v5, 4  ;;  %vm832_vm1 = vcmp.lt.s32.totalorder %v1712_v5, 3  ;;  %vm831_vm2 = vcmp.lt.s32.totalorder %v1712_v5, 2 }
  0xdb   : >> { %v1366_v30 = vadd.s32 4294967294, %v334_v17  ;;  %v822_v17 = vshrl.u32 %v1488_v27, %v1696_v62 }
  0xdd   : >> { %vm1367_vm11 = vcmp.lt.s32.totalorder %v1366_v30, 0 }
  0xde   : >> { %v337_v51 = vsel %vm1367_vm11, 0, %v1366_v30  ;;  %v824_v30 = vshll.u32 %v1488_v27, %v812_v46  ;;  %v815_v27 = vshll.u32 %v1489_v31, %v812_v46 }
  0xdf   : >> { %v338_v22 = vsub.s32 32, %v337_v51  ;;  %v339_v23 = vshll.u32 %v330_v4, %v337_v51  ;;  %v342_v24 = vsub.s32 4294967266, %v337_v51  ;;  %v819_v4 = vshrl.u32 %v1491_v36, %v1696_v62 }
  0xe0   : >> { %v827_v51 = vshll.u32 %v1492_v42, %v812_v46  ;;  %v1727_v36 = vor.u32 %v822_v17, %v821_v6 }
  0xe1   : >> { %v340_v29 = vshrl.u32 %v322_v20, %v338_v22  ;;  %v343_v32 = vadd.s32 127, %v342_v24  ;;  %v825_v20 = vshrl.u32 %v1492_v42, %v1696_v62  ;;  %v551_v22 = vadd.f32 %v550_v41, %v549_v1 }
  0xe2   : >> { %v806_v24 = vor.u32 8388608, %v805_v2  ;;  %v1725_v28 = vor.u32 %v819_v4, %v818_v45  ;;  %v816_v42 = vshrl.u32 %v1490_v33, %v1696_v62  ;;  %v352_v4 = vsub.s32 4, %v1665_v3 }
  0xe3   : >> { %v341_v38 = vor.u32 %v340_v29, %v339_v23  ;;  %v344_v39 = vshll.u32 %v343_v32, 23  ;;  %v828_v29 = vshrl.u32 %v1493_v48, %v1696_v62  ;;  %v826_v32 = vor.u32 %v825_v20, %v824_v30 }
  0xe4   : >> { %v842_v48 = vsel %vm830_vm15, %v1725_v28, %v1727_v36  ;;  %v1749_v40 = vor.u32 %v816_v42, %v815_v27  ;;  %v353_v27 = vsel %vm230_vm13, %v352_v4, %v1665_v3 }
  0xe5   : >> { %v345_v47 = vor.u32 4788187, %v344_v39  ;;  %v348_v49 = vcvt.s32.f32 %v341_v38  ;;  %v829_v35 = vor.u32 %v828_v29, %v827_v51  ;;  %v1737_v38 = vadd.f32 1e-20, %v551_v22 }
  0xe6   : >> { %v1747_v39 = vshll.u32 %v806_v24, 8  ;;  %v838_v56 = vsel %vm830_vm15, %v1749_v40, %v1725_v28 }
  0xe7   : >> { %v346_v53 = vand.u32 2147483647, %v345_v47  ;;  %v843_v33 = vsel %vm833_vm0, %v829_v35, 1326507024  ;;  %v839_v47 = vsel %vm833_vm0, %v826_v32, 920167782  ;;  %1446 = vrsqrt.f32 %v1737_v38 }
  0xe8   : >> { %v840_v57 = vsel %vm832_vm1, %v1727_v36, %v839_v47  ;;  %vm559_vm8 = vweird.f32 %v1737_v38 }
  0xe9   : >> { %v349_v55 = vmul.f32 %v348_v49, %v346_v53  ;;  %v844_v49 = vsel %vm832_vm1, %v826_v32, %v843_v33  ;;  %v841_v41 = vsel %vm831_vm2, %v838_v56, %v840_v57 }
  0xea   : >> { %v845_v53 = vsel %vm831_vm2, %v842_v48, %v844_v49  ;;  %v871_v17 = vand.u32 65535, %v841_v41  ;;  %v872_v22 = vshrl.u32 %v841_v41, 16 }
  0xeb   : >> { %v350_v60 = vxor.u32 2147483648, %v349_v55  ;;  %v850_v25 = vshrl.u32 %v845_v53, 16  ;;  %v849_v46 = vand.u32 65535, %v845_v53  ;;  %v355_v53 = vsel %vm1691_vm14, 0, %v353_v27 }
  0xed   : >> { %v351_v63 = vsel %vm230_vm13, %v350_v60, %v349_v55  ;;  %v847_v55 = vand.u32 65535, %v1747_v39  ;;  %v1771_v45 = vpop.eup %1446 }
  0xee   : >> { %v1705_v26 = vsel %vm1691_vm14, %v1606_v18, %v351_v63  ;;  %vm560_vm9 = vweird.f32 %v1771_v45  ;;  %vm371_vm14 = vweird.f32 %v1606_v18 }
  0xef   : >> { %v1723_v21 = vmul.f32 %v1705_v26, %v1705_v26  ;;  %v852_v1 = vmul.u32 %v850_v25, %v847_v55  ;;  %v851_v20 = vmul.u32 %v849_v46, %v847_v55  ;;  %v874_v48 = vmul.u32 %v872_v22, %v847_v55  ;;  %vm561_vm12 = vmor %vm559_vm8, %vm560_vm9 }
  0xf0   : >> { %vm665_vm8 = vcmp.ne.f32.partialorder %v2193_v15, 0.0 }
  0xf1   : >> { %v364_v37 = vmul.f32 -0.00019511016, %v1723_v21  ;;  %v357_v44 = vmul.f32 -0.001358992, %v1723_v21  ;;  %v855_v51 = vshll.u32 %v852_v1, 16 }
  0xf3   : >> { %v365_v52 = vadd.f32 0.008332121, %v364_v37  ;;  %v358_v60 = vadd.f32 0.041655596, %v357_v44  ;;  %vm859_vm3 = vc.u32 %v851_v20, %v855_v51  ;;  %v861_v37 = vadd.s32 %v855_v51, %v851_v20 }
  0xf4   : >> { %v860_v33 = vsel %vm859_vm3, 1, %v1494_v34  ;;  %v873_v44 = vmul.u32 %v871_v17, %v847_v55  ;;  %v835_v55 = vsel %vm833_vm0, %v1727_v36, 2102212464  ;;  %vm664_vm3 = vcmp.ne.f32.partialorder %v2203_v14, 0.0 }
  0xf5   : >> { %v366_v63 = vmul.f32 %v365_v52, %v1723_v21  ;;  %v359_v6 = vmul.f32 %v358_v60, %v1723_v21  ;;  %v877_v52 = vshll.u32 %v874_v48, 16  ;;  %v814_v60 = vshrl.u32 %v1489_v31, %v1696_v62 }
  0xf6   : >> { %v836_v62 = vsel %vm832_vm1, %v1725_v28, %v835_v55 }
  0xf7   : >> { %v367_v30 = vadd.f32 -0.16666654, %v366_v63  ;;  %v360_v42 = vadd.f32 -0.4999988, %v359_v6  ;;  %vm881_vm5 = vc.u32 %v873_v44, %v877_v52  ;;  %v883_v4 = vadd.s32 %v877_v52, %v873_v44 }
  0xf8   : >> { %v834_v31 = vsel %vm830_vm15, %v814_v60, %v1749_v40 }
  0xf9   : >> { %v368_v35 = vmul.f32 %v367_v30, %v1723_v21  ;;  %v361_v57 = vmul.f32 %v360_v42, %v1723_v21  ;;  %v372_v30 = vand.u32 3, %v355_v53  ;;  %v837_v27 = vsel %vm831_vm2, %v834_v31, %v836_v62 }
  0xfb   : >> { %v362_v20 = vadd.f32 1.0, %v361_v57  ;;  %vm374_vm7 = vcmp.eq.s32.totalorder %v372_v30, 0  ;;  %vm377_vm10 = vcmp.eq.s32.totalorder %v372_v30, 2  ;;  %vm373_vm13 = vcmp.lt.s32.totalorder %v372_v30, 2 }
  0xfd   : >> { %v378_v42 = vxor.u32 2147483648, %v362_v20 }
 0x115   : >> { %v579_v58 = vpop.permute.xlu0 %578 }
 0x116   : >> { %1392 = vpush %v579_v58  ;;  %v848_v58 = vshrl.u32 %v1747_v39, 16 }
 0x118   : >> { %v853_v2 = vmul.u32 %v849_v46, %v848_v58  ;;  %v854_v24 = vmul.u32 %v850_v25, %v848_v58  ;;  %v875_v32 = vmul.u32 %v871_v17, %v848_v58  ;;  %v856_v25 = vshrl.u32 %v852_v1, 16 }
 0x119   : >> { %v876_v3 = vmul.u32 %v872_v22, %v848_v58  ;;  %v369_v46 = vadd.f32 1.0, %v368_v35  ;;  %v882_v58 = vsel %vm881_vm5, 1, %v1494_v34  ;;  %v878_v17 = vshrl.u32 %v874_v48, 16 }
 0x11a   : >> { %v857_v29 = vshll.u32 %v853_v2, 16  ;;  %v862_v49 = vadd.s32 %v860_v33, %v854_v24  ;;  %v879_v56 = vshll.u32 %v875_v32, 16  ;;  %v858_v6 = vshrl.u32 %v853_v2, 16 }
 0x11b   : >> { %v884_v21 = vadd.s32 %v882_v58, %v876_v3  ;;  %v370_v2 = vmul.f32 %v369_v46, %v1705_v26  ;;  %v880_v51 = vshrl.u32 %v875_v32, 16  ;;  %v526_v26 = vadd.s32 3, %v355_v53 }
 0x11c   : >> { %vm863_vm4 = vc.u32 %v861_v37, %v857_v29  ;;  %vm885_vm6 = vc.u32 %v883_v4, %v879_v56  ;;  %v1803_v24 = vadd.s32 %v883_v4, %v879_v56  ;;  %v891_v32 = vmul.u32 %v1747_v39, %v837_v27 }
 0x11d   : >> { %v586_v23 = vpop.permute.xlu0 %585  ;;  %v864_v63 = vsel %vm863_vm4, 1, %v1494_v34  ;;  %v886_v36 = vsel %vm885_vm6, 1, %v1494_v34  ;;  %v375_v28 = vxor.u32 2147483648, %v370_v2  ;;  %v379_v48 = vsel %vm377_vm10, %v378_v42, %v370_v2 }
 0x11e   : >> { %1394 = vpush %v586_v23  ;;  %v554_v23 = vmul.f32 %v1771_v45, %v1737_v38  ;;  %v866_v41 = vadd.s32 %v864_v63, %v862_v49  ;;  %v888_v22 = vadd.s32 %v886_v36, %v884_v21  ;;  %v527_v33 = vand.u32 3, %v526_v26 }
 0x11f   : >> { %v376_v37 = vsel %vm374_vm7, %v362_v20, %v375_v28  ;;  %v1823_v56 = vstv %s1391_s22  ;;  %vm800_vm5 = vcmp.lt.s32.totalorder %v1669_v19, 0  ;;  %vm1951_vm6 = vcmp.le.f32.partialorder %v798_v61, 0.7853982 }
 0x120   : >> { %v555_v47 = vmul.f32 %v1771_v45, %v554_v23  ;;  %v867_v1 = vadd.s32 %v866_v41, %v856_v25  ;;  %v889_v40 = vadd.s32 %v888_v22, %v878_v17  ;;  %v380_v49 = vsel %vm373_vm13, %v376_v37, %v379_v48 }
 0x121   : >> { %vm529_vm15 = vcmp.eq.s32.totalorder %v527_v33, 0  ;;  %vm532_vm0 = vcmp.eq.s32.totalorder %v527_v33, 2  ;;  %v1820_v25 = vsel %vm371_vm14, nan, %v380_v49  ;;  %vm528_vm1 = vcmp.lt.s32.totalorder %v527_v33, 2 }
 0x122   : >> { %v556_v59 = vmul.f32 0.5, %v555_v47  ;;  %v1801_v23 = vadd.s32 %v867_v1, %v858_v6  ;;  %v890_v34 = vadd.s32 %v889_v40, %v880_v51  ;;  %v531_v60 = vsel %vm529_vm15, %v362_v20, %v375_v28 }
 0x123   : >> { %v576_v55 = vsub.f32 %v2196_v11, %v1823_v56  ;;  %v1863_v18 = vperm.slane %v1820_v25, 6 }
 0x124   : >> { %v557_v29 = vsub.f32 1.5, %v556_v59  ;;  %vm893_vm11 = vc.u32 %v1801_v23, %v1803_v24  ;;  %v894_v5 = vadd.s32 1, %v890_v34 }
 0x126   : >> { %v558_v35 = vmul.f32 %v1771_v45, %v557_v29  ;;  %v895_v38 = vsel %vm893_vm11, %v894_v5, %v890_v34 }
 0x127   : >> { %v896_v44 = vadd.s32 %v895_v38, %v891_v32 }
 0x128   : >> { %v562_v47 = vsel %vm561_vm12, %v1771_v45, %v558_v35  ;;  %v2167_v45 = vsub.f32 1.0, %v1820_v25 }
 0x129   : >> { %v897_v39 = vadd.s32 536870912, %v896_v44  ;;  %v563_v52 = vmul.f32 %v562_v47, %v1675_v43  ;;  %v564_v3 = vmul.f32 %v562_v47, %v1679_v50  ;;  %v534_v43 = vsel %vm532_vm0, %v378_v42, %v370_v2 }
 0x12a   : >> { %v565_v63 = vmul.f32 %v562_v47, %v1682_v54  ;;  %v535_v6 = vsel %vm528_vm1, %v531_v60, %v534_v43  ;;  %v567_v58 = vrot.slane %v2167_v45, 3  ;;  %vm941_vm1 = vweird.f32 %v1669_v19 }
 0x12b   : >> { %v1816_v53 = vshrl.u32 %v897_v39, 30  ;;  %v1832_v41 = vperm.slane %v563_v52, 3  ;;  %v1838_v59 = vperm.slane %v564_v3, 3  ;;  %v1849_v21 = vsel %vm371_vm14, nan, %v535_v6 }
 0x12c   : >> { %v1844_v17 = vperm.slane %v565_v63, 3  ;;  %v1854_v36 = vmul.f32 %v567_v58, %v563_v52  ;;  %v1858_v2 = vmul.f32 %v567_v58, %v565_v63  ;;  %v1866_v29 = vmul.f32 %v567_v58, %v564_v3 }
 0x12d   : >> { %v899_v46 = vshll.u32 %v1816_v53, 30  ;;  %v593_v54 = vmul.f32 %v1832_v41, %v576_v55  ;;  %v619_v62 = vmul.f32 %v1838_v59, %v576_v55  ;;  %v1871_v28 = vperm.slane %v1849_v21, 6 }
 0x12e   : >> { %v611_v40 = vmul.f32 %v1844_v17, %v576_v55  ;;  %v631_v5 = vperm.slane %v1854_v36, 3  ;;  %v2168_v49 = vperm.slane %v1866_v29, 3  ;;  %v624_v39 = vmul.f32 %v1863_v18, %v576_v55 }
 0x12f   : >> { %v1834_v50 = vsub.s32 %v896_v44, %v899_v46  ;;  %v657_v44 = vperm.slane %v1858_v2, 3  ;;  %v2208_v61 = vperm.slane %v1866_v29, 3 }
 0x131   : >> { %v902_v1 = vsub.s32 0, %v1834_v50  ;;  %vm901_vm2 = vcmp.lt.s32.totalorder %v1834_v50, 0 }
 0x133   : >> { %v903_v22 = vsel %vm901_vm2, %v902_v1, %v1834_v50  ;;  %vm789_vm2 = vcmp.ne.f32.partialorder %v1572_v9, 0.0 }
 0x134   : >> { %v904_v37 = vclz %v903_v22 }
 0x136   : >> { %v1372_v43 = vadd.s32 4294967294, %v904_v37  ;;  %v892_v37 = vadd.s32 %v1803_v24, %v1801_v23 }
 0x138   : >> { %vm1373_vm4 = vcmp.lt.s32.totalorder %v1372_v43, 0 }
 0x147   : >> { %s1393_s23 = spop %1392 }
 0x148   : >> { %v1826_v57 = vstv %s1393_s23 }
 0x149   : >> { %v583_v4 = vsub.f32 %v2197_v10, %v1826_v57 }
 0x14b   : >> { %v596_v30 = vmul.f32 %v1838_v59, %v583_v4  ;;  %v617_v31 = vmul.f32 %v1832_v41, %v583_v4  ;;  %v607_v27 = vmul.f32 %v1844_v17, %v583_v4  ;;  %v638_v46 = vmul.f32 %v1863_v18, %v583_v4 }
 0x14d   : >> { %v598_v42 = vadd.f32 %v596_v30, %v593_v54  ;;  %v621_v32 = vsub.f32 %v617_v31, %v619_v62 }
 0x14f   : >> { %s1395_s24 = spop %1394  ;;  %v653_v3 = vmul.f32 %v1871_v28, %v621_v32  ;;  %v907_v32 = vsel %vm1373_vm4, 0, %v1372_v43 }
 0x150   : >> { %v1856_v20 = vstv %s1395_s24 }
 0x151   : >> { %v590_v51 = vsub.f32 %v2199_v7, %v1856_v20 }
 0x153   : >> { %v601_v34 = vmul.f32 %v1844_v17, %v590_v51  ;;  %v605_v26 = vmul.f32 %v1838_v59, %v590_v51  ;;  %v613_v35 = vmul.f32 %v1832_v41, %v590_v51  ;;  %v651_v33 = vmul.f32 %v1863_v18, %v590_v51 }
 0x155   : >> { %v603_v48 = vadd.f32 %v601_v34, %v598_v42  ;;  %v609_v38 = vsub.f32 %v605_v26, %v607_v27  ;;  %v615_v47 = vsub.f32 %v611_v40, %v613_v35  ;;  %v655_v58 = vadd.f32 %v653_v3, %v651_v33 }
 0x156   : >> { %v584_v3 = vsub.f32 %v2195_v12, %v1826_v57 }
 0x157   : >> { %v627_v52 = vmul.f32 %v1871_v28, %v609_v38  ;;  %v640_v60 = vmul.f32 %v1871_v28, %v615_v47  ;;  %v632_v6 = vmul.f32 %v631_v5, %v603_v48  ;;  %v658_v1 = vmul.f32 %v657_v44, %v603_v48 }
 0x158   : >> { %v645_v55 = vmul.f32 %v2168_v49, %v603_v48  ;;  %v908_v48 = vsub.s32 32, %v907_v32  ;;  %v591_v38 = vsub.f32 %v2198_v8, %v1856_v20 }
 0x159   : >> { %v629_v63 = vadd.f32 %v627_v52, %v624_v39  ;;  %v642_v54 = vadd.f32 %v640_v60, %v638_v46  ;;  %v660_v31 = vadd.f32 %v658_v1, %v655_v58  ;;  %v577_v52 = vsub.f32 %v2194_v13, %v1823_v56 }
 0x15a   : >> { %v909_v46 = vshll.u32 %v1834_v50, %v907_v32  ;;  %v910_v60 = vshrl.u32 %v892_v37, %v908_v48  ;;  %v606_v43 = vmul.f32 %v1838_v59, %v591_v38  ;;  %v912_v58 = vsub.s32 4294967266, %v907_v32 }
 0x15b   : >> { %v634_v30 = vadd.f32 %v632_v6, %v629_v63  ;;  %v647_v62 = vadd.f32 %v645_v55, %v642_v54  ;;  %v662_v51 = vadd.f32 %v660_v31, %v1856_v20  ;;  %v594_v1 = vmul.f32 %v1832_v41, %v577_v52 }
 0x15c   : >> { %v597_v54 = vmul.f32 %v1838_v59, %v584_v3  ;;  %v608_v55 = vmul.f32 %v1844_v17, %v584_v3  ;;  %v614_v31 = vmul.f32 %v1832_v41, %v591_v38  ;;  %v911_v50 = vor.u32 %v910_v60, %v909_v46 }
 0x15d   : >> { %v636_v4 = vadd.f32 %v634_v30, %v1823_v56  ;;  %v649_v22 = vadd.f32 %v647_v62, %v1826_v57  ;;  %v1899_v40 = vsel %vm664_vm3, %v662_v51, %v2199_v7  ;;  %v612_v30 = vmul.f32 %v1844_v17, %v577_v52 }
 0x15e   : >> { %2204 = vst [vmem:[#allocation12_spill] sm:$0xff] %v1899_v40  ;;  %v681_v26 = vrot.slane %v1899_v40, 7  ;;  %v610_v51 = vsub.f32 %v606_v43, %v608_v55  ;;  %v599_v37 = vadd.f32 %v597_v54, %v594_v1  ;;  %v625_v60 = vmul.f32 %v1863_v18, %v577_v52 }
 0x15f   : >> { %v1896_v27 = vsel %vm664_vm3, %v636_v4, %v2196_v11  ;;  %v1902_v42 = vsel %vm664_vm3, %v649_v22, %v2197_v10  ;;  %v913_v4 = vadd.s32 127, %v912_v58  ;;  %v620_v22 = vmul.f32 %v1838_v59, %v577_v52 }
 0x160   : >> { %2205 = vst [vmem:[#allocation13_spill] sm:$0xff] %v1902_v42  ;;  %v673_v34 = vrot.slane %v1896_v27, 7  ;;  %v677_v35 = vrot.slane %v1902_v42, 7  ;;  %v1918_v39 = vsub.f32 %v1899_v40, %v681_v26  ;;  %v618_v26 = vmul.f32 %v1832_v41, %v584_v3 }
 0x161   : >> { %v616_v48 = vsub.f32 %v612_v30, %v614_v31  ;;  %v628_v45 = vmul.f32 %v1871_v28, %v610_v51  ;;  %vm790_vm3 = vcmp.ne.f32.partialorder %v1586_v16, 0.0 }
 0x162   : >> { %v1912_v33 = vsub.f32 %v1896_v27, %v673_v34  ;;  %v1915_v47 = vsub.f32 %v1902_v42, %v677_v35  ;;  %v687_v6 = vmul.f32 %v1918_v39, %v1918_v39  ;;  %v602_v34 = vmul.f32 %v1844_v17, %v591_v38 }
 0x163   : >> { %v914_v35 = vshll.u32 %v913_v4, 23  ;;  %v641_v59 = vmul.f32 %v1871_v28, %v616_v48  ;;  %v652_v17 = vmul.f32 %v1863_v18, %v591_v38  ;;  %v630_v41 = vadd.f32 %v628_v45, %v625_v60 }
 0x164   : >> { %v684_v23 = vmul.f32 %v1912_v33, %v1912_v33  ;;  %v685_v24 = vmul.f32 %v1915_v47, %v1915_v47  ;;  %v604_v49 = vadd.f32 %v602_v34, %v599_v37  ;;  %v922_v4 = vsub.s32 4, %v1816_v53 }
 0x166   : >> { %v686_v63 = vadd.f32 %v685_v24, %v684_v23  ;;  %v915_v23 = vor.u32 4788187, %v914_v35  ;;  %v918_v24 = vcvt.s32.f32 %v911_v50  ;;  %v659_v54 = vmul.f32 %v657_v44, %v604_v49 }
 0x167   : >> { %v633_v45 = vmul.f32 %v631_v5, %v604_v49  ;;  %v646_v44 = vmul.f32 %v2208_v61, %v604_v49 }
 0x168   : >> { %v688_v62 = vadd.f32 %v687_v6, %v686_v63  ;;  %v622_v63 = vsub.f32 %v618_v26, %v620_v22  ;;  %v916_v46 = vand.u32 2147483647, %v915_v23  ;;  %v639_v6 = vmul.f32 %v1863_v18, %v584_v3 }
 0x169   : >> { %v1974_v26 = vperm.slane %v1896_v27, 5  ;;  %v1981_v23 = vperm.slane %v1902_v42, 5 }
 0x16a   : >> { %v689_v32 = vadd.f32 1e-20, %v688_v62  ;;  %v919_v43 = vmul.f32 %v918_v24, %v916_v46  ;;  %v654_v1 = vmul.f32 %v1871_v28, %v622_v63  ;;  %v643_v18 = vadd.f32 %v641_v59, %v639_v6 }
 0x16b   : >> { %v635_v28 = vadd.f32 %v633_v45, %v630_v41  ;;  %v923_v24 = vsel %vm800_vm5, %v922_v4, %v1816_v53  ;;  %v709_v63 = vsub.f32 %v1896_v27, %v1974_v26 }
 0x16c   : >> { %1448 = vrsqrt.f32 %v689_v32  ;;  %v920_v55 = vxor.u32 2147483648, %v919_v43  ;;  %v656_v3 = vadd.f32 %v654_v1, %v652_v17  ;;  %v648_v50 = vadd.f32 %v646_v44, %v643_v18 }
 0x16d   : >> { %v637_v22 = vadd.f32 %v635_v28, %v1823_v56  ;;  %vm696_vm9 = vweird.f32 %v689_v32  ;;  %v748_v56 = vperm.slane %v1820_v25, 7 }
 0x16e   : >> { %v921_v30 = vsel %vm800_vm5, %v920_v55, %v919_v43  ;;  %v661_v62 = vadd.f32 %v659_v54, %v656_v3  ;;  %v650_v48 = vadd.f32 %v648_v50, %v1826_v57  ;;  %v1995_v57 = vperm.slane %v1899_v40, 5 }
 0x16f   : >> { %v1962_v2 = vsel %vm1951_vm6, %v1669_v19, %v921_v30  ;;  %v925_v43 = vsel %vm1951_vm6, 0, %v923_v24  ;;  %v749_v18 = vmul.f32 %v748_v56, %v709_v63 }
 0x170   : >> { %v1968_v36 = vmul.f32 %v1962_v2, %v1962_v2  ;;  %v663_v29 = vadd.f32 %v661_v62, %v1856_v20  ;;  %v1990_v20 = vsel %vm665_vm8, %v637_v22, %v2194_v13  ;;  %2209 = vst [vmem:[#allocation14_spill] sm:$0xff] %v1995_v57  ;;  %v715_v52 = vsub.f32 %v1899_v40, %v1995_v57 }
 0x171   : >> { %v710_v53 = vsub.f32 %v1990_v20, %v1974_v26 }
 0x172   : >> { %v1449_v58 = vpop.eup %1448  ;;  %v927_v51 = vmul.f32 -0.001358992, %v1968_v36  ;;  %v934_v37 = vmul.f32 -0.00019511016, %v1968_v36  ;;  %v2007_v17 = vsel %vm665_vm8, %v663_v29, %v2198_v8  ;;  %v2030_v24 = vmul.f32 %v748_v56, %v715_v52 }
 0x173   : >> { %v691_v38 = vmul.f32 %v1449_v58, %v689_v32  ;;  %vm697_vm7 = vweird.f32 %v1449_v58  ;;  %2210 = vst [vmem:[#allocation15_spill] sm:$0xff] %v2007_v17  ;;  %v750_v3 = vmul.f32 %v748_v56, %v710_v53 }
 0x174   : >> { %v928_v35 = vadd.f32 0.041655596, %v927_v51  ;;  %vm698_vm10 = vmor %vm696_vm9, %vm697_vm7  ;;  %v935_v6 = vadd.f32 0.008332121, %v934_v37 }
 0x175   : >> { %v692_v31 = vmul.f32 %v1449_v58, %v691_v38  ;;  %v716_v38 = vsub.f32 %v2007_v17, %v1995_v57 }
 0x176   : >> { %v929_v41 = vmul.f32 %v928_v35, %v1968_v36  ;;  %v936_v61 = vmul.f32 %v935_v6, %v1968_v36 }
 0x177   : >> { %v693_v5 = vmul.f32 0.5, %v692_v31 }
 0x178   : >> { %v930_v31 = vadd.f32 -0.4999988, %v929_v41  ;;  %v2034_v41 = vand.u32 3, %v925_v43  ;;  %v937_v0 = vadd.f32 -0.16666654, %v936_v61 }
 0x179   : >> { %v694_v34 = vsub.f32 1.5, %v693_v5 }
 0x17a   : >> { %vm943_vm11 = vcmp.lt.s32.totalorder %v2034_v41, 2  ;;  %vm947_vm12 = vcmp.eq.s32.totalorder %v2034_v41, 2  ;;  %vm944_vm14 = vcmp.eq.s32.totalorder %v2034_v41, 0 }
 0x17b   : >> { %v695_v49 = vmul.f32 %v1449_v58, %v694_v34 }
 0x17d   : >> { %v699_v32 = vsel %vm698_vm10, %v1449_v58, %v695_v49  ;;  %v712_v58 = vsub.f32 %v1902_v42, %v1981_v23 }
 0x17e   : >> { %v700_v46 = vmul.f32 %v699_v32, %v1912_v33  ;;  %v701_v60 = vmul.f32 %v699_v32, %v1915_v47  ;;  %v2000_v59 = vmul.f32 %v699_v32, %v1918_v39  ;;  %v2015_v33 = vsel %vm665_vm8, %v650_v48, %v2195_v12 }
 0x17f   : >> { %2211 = vst [vmem:[#allocation16_spill] sm:$0xff] %v2015_v33  ;;  %v2212_v47 = vsub.f32 1.0, %v1820_v25  ;;  %v713_v54 = vsub.f32 %v2015_v33, %v1981_v23  ;;  %v1096_v25 = vadd.s32 3, %v925_v43  ;;  %v763_v35 = vmul.f32 %v748_v56, %v712_v58 }
 0x180   : >> { %v717_v1 = vperm.slane %v700_v46, 6  ;;  %v720_v55 = vperm.slane %v701_v60, 6  ;;  %v725_v45 = vperm.slane %v2000_v59, 6  ;;  %v751_v48 = vperm.slane %v1849_v21, 7 }
 0x181   : >> { %v703_v39 = vrot.slane %v2212_v47, 1  ;;  %v764_v37 = vmul.f32 %v748_v56, %v713_v54  ;;  %v2032_v32 = vmul.f32 %v748_v56, %v716_v38  ;;  %v1097_v7 = vand.u32 3, %v1096_v25 }
 0x182   : >> { %v718_v30 = vmul.f32 %v717_v1, %v709_v63  ;;  %v719_v28 = vmul.f32 %v717_v1, %v710_v53  ;;  %v721_v44 = vmul.f32 %v720_v55, %v712_v58  ;;  %v730_v62 = vmul.f32 %v720_v55, %v715_v52 }
 0x183   : >> { %v732_v5 = vmul.f32 %v725_v45, %v712_v58  ;;  %v738_v50 = vmul.f32 %v717_v1, %v715_v52  ;;  %v722_v4 = vmul.f32 %v720_v55, %v713_v54  ;;  %v731_v51 = vmul.f32 %v720_v55, %v716_v38 }
 0x184   : >> { %v733_v22 = vmul.f32 %v725_v45, %v713_v54  ;;  %v736_v34 = vmul.f32 %v725_v45, %v709_v63  ;;  %v737_v29 = vmul.f32 %v725_v45, %v710_v53  ;;  %v739_v49 = vmul.f32 %v717_v1, %v716_v38 }
 0x185   : >> { %v723_v6 = vadd.f32 %v721_v44, %v718_v30  ;;  %v734_v47 = vsub.f32 %v730_v62, %v732_v5  ;;  %v724_v8 = vadd.f32 %v722_v4, %v719_v28  ;;  %v931_v12 = vmul.f32 %v930_v31, %v1968_v36 }
 0x186   : >> { %v735_v10 = vsub.f32 %v731_v51, %v733_v22  ;;  %v740_v11 = vsub.f32 %v736_v34, %v738_v50  ;;  %v705_v13 = vmul.f32 %v703_v39, %v700_v46  ;;  %v726_v14 = vmul.f32 %v725_v45, %v715_v52 }
 0x187   : >> { %v727_v15 = vmul.f32 %v725_v45, %v716_v38  ;;  %v741_v17 = vsub.f32 %v737_v29, %v739_v49  ;;  %v742_v21 = vmul.f32 %v717_v1, %v712_v58  ;;  %v743_v40 = vmul.f32 %v717_v1, %v713_v54 }
 0x188   : >> { %v744_v33 = vmul.f32 %v720_v55, %v709_v63  ;;  %v745_v56 = vmul.f32 %v720_v55, %v710_v53  ;;  %v706_v57 = vmul.f32 %v703_v39, %v701_v60  ;;  %v728_v43 = vadd.f32 %v726_v14, %v723_v6 }
 0x189   : >> { %v752_v42 = vmul.f32 %v751_v48, %v734_v47  ;;  %v938_v30 = vmul.f32 %v937_v0, %v1968_v36  ;;  %v729_v61 = vadd.f32 %v727_v15, %v724_v8  ;;  %v753_v25 = vmul.f32 %v751_v48, %v735_v10 }
 0x18a   : >> { %v765_v28 = vmul.f32 %v751_v48, %v740_v11  ;;  %v932_v44 = vadd.f32 1.0, %v931_v12  ;;  %v766_v62 = vmul.f32 %v751_v48, %v741_v17  ;;  %vm1102_vm13 = vcmp.eq.s32.totalorder %v1097_v7, 2 }
 0x18b   : >> { %v707_v46 = vmul.f32 %v703_v39, %v2000_v59  ;;  %v746_v58 = vsub.f32 %v742_v21, %v744_v33  ;;  %v747_v63 = vsub.f32 %v743_v40, %v745_v56  ;;  %v756_v53 = vperm.slane %v705_v13, 6 }
 0x18c   : >> { %v754_v60 = vadd.f32 %v752_v42, %v749_v18  ;;  %v769_v14 = vperm.slane %v706_v57, 6  ;;  %v939_v1 = vadd.f32 1.0, %v938_v30  ;;  %v948_v54 = vxor.u32 2147483648, %v932_v44 }
 0x18d   : >> { %v755_v0 = vadd.f32 %v753_v25, %v750_v3  ;;  %v757_v8 = vmul.f32 %v756_v53, %v728_v43  ;;  %v758_v10 = vmul.f32 %v756_v53, %v729_v61  ;;  %v767_v11 = vadd.f32 %v765_v28, %v763_v35 }
 0x18e   : >> { %v768_v12 = vadd.f32 %v766_v62, %v764_v37  ;;  %v770_v15 = vmul.f32 %v769_v14, %v728_v43  ;;  %v771_v36 = vmul.f32 %v769_v14, %v729_v61  ;;  %v940_v17 = vmul.f32 %v939_v1, %v1962_v2  ;;  %v2214_v1 = vld [vmem:[#allocation14_spill] sm:$0xff] }
 0x18f   : >> { %v778_v52 = vmul.f32 %v751_v48, %v746_v58  ;;  %v779_v55 = vmul.f32 %v751_v48, %v747_v63  ;;  %vm1099_vm15 = vcmp.eq.s32.totalorder %v1097_v7, 0  ;;  %vm1098_vm0 = vcmp.lt.s32.totalorder %v1097_v7, 2  ;;  %v2213_v63 = vld [vmem:[#allocation13_spill] sm:$0xff] }
 0x190   : >> { %v945_v40 = vxor.u32 2147483648, %v940_v17  ;;  %v949_v13 = vsel %vm947_vm12, %v948_v54, %v940_v17  ;;  %v1104_v42 = vsel %vm1102_vm13, %v948_v54, %v940_v17  ;;  %v759_v57 = vadd.f32 %v757_v8, %v754_v60  ;;  %v2215_v8 = vld [vmem:[#allocation16_spill] sm:$0xff] }
 0x191   : >> { %v760_v59 = vadd.f32 %v758_v10, %v755_v0  ;;  %v782_v33 = vperm.slane %v707_v46, 6  ;;  %v772_v39 = vadd.f32 %v770_v15, %v767_v11  ;;  %v773_v45 = vadd.f32 %v771_v36, %v768_v12  ;;  %v2072_v15 = vld [vmem:[%s1603_s21] sm:$0xff] }
 0x192   : >> { %v946_v2 = vsel %vm944_vm14, %v932_v44, %v945_v40  ;;  %v1101_v38 = vsel %vm1099_vm15, %v932_v44, %v945_v40  ;;  %v780_v18 = vadd.f32 %v778_v52, %v2030_v24  ;;  %v781_v3 = vadd.f32 %v779_v55, %v2032_v32 }
 0x193   : >> { %v950_v31 = vsel %vm943_vm11, %v946_v2, %v949_v13  ;;  %v1105_v5 = vsel %vm1098_vm0, %v1101_v38, %v1104_v42  ;;  %v783_v50 = vmul.f32 %v782_v33, %v728_v43  ;;  %v784_v7 = vmul.f32 %v782_v33, %v729_v61  ;;  %v2216_v33 = vld [vmem:[#allocation12_spill] sm:$0xff] }
 0x194   : >> { %v951_v4 = vsel %vm941_vm1, nan, %v950_v31  ;;  %v1106_v51 = vsel %vm941_vm1, nan, %v1105_v5  ;;  %v761_v49 = vadd.f32 %v759_v57, %v1974_v26  ;;  %v762_v35 = vadd.f32 %v760_v59, %v1974_v26 }
 0x195   : >> { %v1108_v22 = vrot.slane %v951_v4, 1  ;;  %v1111_v34 = vrot.slane %v951_v4, 2  ;;  %v1115_v29 = vrot.slane %v1106_v51, 1  ;;  %v1118_v19 = vrot.slane %v1106_v51, 2 }
 0x196   : >> { %v774_v41 = vadd.f32 %v772_v39, %v1981_v23  ;;  %v775_v6 = vadd.f32 %v773_v45, %v1981_v23  ;;  %v785_v47 = vadd.f32 %v783_v50, %v780_v18  ;;  %v786_v21 = vadd.f32 %v784_v7, %v781_v3  ;;  %v2217_v45 = vld [vmem:[#allocation15_spill] sm:$0xff] }
 0x197   : >> { %v1110_v37 = vmul.f32 %v1108_v22, %v951_v4  ;;  %v1117_v48 = vmul.f32 %v1115_v29, %v1106_v51  ;;  %v1122_v24 = vmul.f32 %v1108_v22, %v1106_v51  ;;  %v1124_v32 = vmul.f32 %v1115_v29, %v951_v4 }
 0x198   : >> { %v791_v62 = vsel %vm789_vm2, %v761_v49, %v1896_v27  ;;  %v792_v23 = vsel %vm790_vm3, %v762_v35, %v1990_v20  ;;  %v793_v53 = vsel %vm789_vm2, %v774_v41, %v2213_v63  ;;  %v787_v54 = vadd.f32 %v785_v47, %v2214_v1 }
 0x199   : >> { %v1113_v56 = vmul.f32 %v1111_v34, %v1110_v37  ;;  %v1120_v43 = vmul.f32 %v1118_v19, %v1117_v48  ;;  %v1123_v30 = vmul.f32 %v1122_v24, %v1111_v34  ;;  %v1125_v61 = vmul.f32 %v1124_v32, %v1118_v19 }
 0x19a   : >> { %v1127_v25 = vmul.f32 %v1124_v32, %v1111_v34  ;;  %v1128_v26 = vmul.f32 %v1122_v24, %v1118_v19  ;;  %v1130_v28 = vmul.f32 %v1118_v19, %v1110_v37  ;;  %v1131_v44 = vmul.f32 %v1117_v48, %v1111_v34 }
 0x19b   : >> { %v1121_v46 = vadd.f32 %v1120_v43, %v1113_v56  ;;  %v1126_v58 = vsub.f32 %v1123_v30, %v1125_v61  ;;  %v788_v0 = vadd.f32 %v786_v21, %v2214_v1  ;;  %v794_v27 = vsel %vm790_vm3, %v775_v6, %v2215_v8 }
 0x19c   : >> { %v1129_v60 = vadd.f32 %v1128_v26, %v1127_v25  ;;  %v1132_v14 = vsub.f32 %v1130_v28, %v1131_v44  ;;  %v1169_v20 = vperm.slane %v2072_v15, 0  ;;  %v1189_v36 = vperm.slane %v2072_v15, 1 }
 0x19d   : >> { %v1133_v10 = vmul.f32 2.0, %v1126_v58  ;;  %v795_v39 = vsel %vm789_vm2, %v787_v54, %v2216_v33  ;;  %v796_v2 = vsel %vm790_vm3, %v788_v0, %v2217_v45 }
 0x19e   : >> { %v1135_v11 = vmul.f32 2.0, %v1129_v60  ;;  %v1137_v12 = vmul.f32 2.0, %v1132_v14 }
 0x19f   : >> { %v1134_v17 = vmul.f32 %v1133_v10, %v1126_v58  ;;  %v1139_v52 = vmul.f32 %v1133_v10, %v1129_v60  ;;  %v1140_v55 = vmul.f32 %v1133_v10, %v1132_v14  ;;  %v1142_v40 = vmul.f32 %v1133_v10, %v1121_v46 }
 0x1a0   : >> { %v1136_v13 = vmul.f32 %v1135_v11, %v1129_v60  ;;  %v1138_v42 = vmul.f32 %v1137_v12, %v1132_v14  ;;  %v1141_v57 = vmul.f32 %v1135_v11, %v1132_v14  ;;  %v1143_v59 = vmul.f32 %v1135_v11, %v1121_v46 }
 0x1a1   : >> { %v1144_v38 = vmul.f32 %v1137_v12, %v1121_v46  ;;  %v1150_v18 = vsub.f32 1.0, %v1134_v17  ;;  %v1210_v11 = vperm.slane %v2072_v15, 2 }
 0x1a2   : >> { %v1145_v3 = vsub.f32 1.0, %v1136_v13  ;;  %v1148_v31 = vadd.f32 %v1143_v59, %v1140_v55  ;;  %v1152_v5 = vsub.f32 %v1141_v57, %v1142_v40  ;;  %v1153_v50 = vsub.f32 %v1140_v55, %v1143_v59 }
 0x1a3   : >> { %v1147_v7 = vsub.f32 %v1139_v52, %v1144_v38  ;;  %v1149_v4 = vadd.f32 %v1144_v38, %v1139_v52  ;;  %v1151_v51 = vsub.f32 %v1150_v18, %v1138_v42  ;;  %v1154_v22 = vadd.f32 %v1142_v40, %v1141_v57 }
 0x1a4   : >> { %v1146_v34 = vsub.f32 %v1145_v3, %v1138_v42  ;;  %v1155_v29 = vsub.f32 %v1150_v18, %v1136_v13  ;;  %v1164_v19 = vperm.slane %v1148_v31, 3  ;;  %v1184_v49 = vperm.slane %v1152_v5, 3 }
 0x1a5   : >> { %v1159_v35 = vperm.slane %v1147_v7, 3  ;;  %v1176_v37 = vperm.slane %v1149_v4, 3  ;;  %v1179_v48 = vperm.slane %v1151_v51, 3  ;;  %v1197_v24 = vperm.slane %v1153_v50, 3 }
 0x1a6   : >> { %v1156_v32 = vperm.slane %v1146_v34, 3  ;;  %v1165_v41 = vmul.f32 %v1164_v19, %v795_v39  ;;  %v1166_v6 = vmul.f32 %v1164_v19, %v796_v2  ;;  %v1185_v47 = vmul.f32 %v1184_v49, %v795_v39 }
 0x1a7   : >> { %v1160_v21 = vmul.f32 %v1159_v35, %v793_v53  ;;  %v1161_v56 = vmul.f32 %v1159_v35, %v794_v27  ;;  %v1177_v43 = vmul.f32 %v1176_v37, %v791_v62  ;;  %v1178_v30 = vmul.f32 %v1176_v37, %v792_v23 }
 0x1a8   : >> { %v1157_v61 = vmul.f32 %v1156_v32, %v791_v62  ;;  %v1158_v25 = vmul.f32 %v1156_v32, %v792_v23  ;;  %v1180_v26 = vmul.f32 %v1179_v48, %v793_v53  ;;  %v1181_v28 = vmul.f32 %v1179_v48, %v794_v27 }
 0x1a9   : >> { %v1186_v44 = vmul.f32 %v1184_v49, %v796_v2  ;;  %v1198_v46 = vmul.f32 %v1197_v24, %v791_v62  ;;  %v1199_v58 = vmul.f32 %v1197_v24, %v792_v23  ;;  %v1200_v63 = vperm.slane %v1154_v22, 3 }
 0x1aa   : >> { %v1162_v60 = vadd.f32 %v1160_v21, %v1157_v61  ;;  %v1163_v14 = vadd.f32 %v1161_v56, %v1158_v25  ;;  %v1182_v1 = vadd.f32 %v1180_v26, %v1177_v43  ;;  %v1183_v54 = vadd.f32 %v1181_v28, %v1178_v30 }
 0x1ab   : >> { %v1201_v0 = vmul.f32 %v1200_v63, %v793_v53  ;;  %v1202_v8 = vmul.f32 %v1200_v63, %v794_v27  ;;  %v1205_v10 = vperm.slane %v1155_v29, 3 }
 0x1ac   : >> { %v1167_v12 = vadd.f32 %v1165_v41, %v1162_v60  ;;  %v1168_v17 = vadd.f32 %v1166_v6, %v1163_v14  ;;  %v1187_v52 = vadd.f32 %v1185_v47, %v1182_v1  ;;  %v1188_v55 = vadd.f32 %v1186_v44, %v1183_v54 }
 0x1ad   : >> { %v1203_v40 = vadd.f32 %v1201_v0, %v1198_v46  ;;  %v1204_v13 = vadd.f32 %v1202_v8, %v1199_v58  ;;  %v1206_v62 = vmul.f32 %v1205_v10, %v795_v39  ;;  %v1207_v23 = vmul.f32 %v1205_v10, %v796_v2 }
 0x1ae   : >> { %v1170_v42 = vadd.f32 %v1169_v20, %v1167_v12  ;;  %v1171_v53 = vadd.f32 %v1169_v20, %v1168_v17  ;;  %v1190_v27 = vadd.f32 %v1189_v36, %v1187_v52  ;;  %v1191_v57 = vadd.f32 %v1189_v36, %v1188_v55 }
 0x1af   : >> { %v1208_v59 = vadd.f32 %v1206_v62, %v1203_v40  ;;  %v1209_v33 = vadd.f32 %v1207_v23, %v1204_v13 }
 0x1b0   : >> { %1174 = vst [vmem:[%s1173_s25] sm:$0xff] %v1170_v42 }
 0x1b1   : >> { %1175 = vst [vmem:[%s1173_s25 + $0x20] sm:$0xff] %v1171_v53  ;;  %v1211_v45 = vadd.f32 %v1210_v11, %v1208_v59  ;;  %v1212_v38 = vadd.f32 %v1210_v11, %v1209_v33  ;;  %220 = sbr.rel (!%p218_p8) target bundleno = 158 (0x9e), region = 96 }
 0x1b2   : >> { %1379 = vst [vmem:[%s1173_s25 + $0x40] sm:$0xff] %v1190_v27 }
 0x1b3   : >> { %1380 = vst [vmem:[%s1173_s25 + $0x60] sm:$0xff] %v1191_v57 }
 0x1b4   : >> { %1382 = vst [vmem:[%s1173_s25 + $0x80] sm:$0xff] %v1211_v45 }
 0x1b5   : >> { %1383 = vst [vmem:[%s1173_s25 + $0xa0] sm:$0xff] %v1212_v38 }
 0x1b6   : > { %1224 = sbr.rel (!%p1540_p4) target bundleno = 469 (0x1d5), region = 43  ;;  %s1388_s26 = sshll.u32 (%p1540_p4), %s1528_s15, 5 }
 0x1b7   : > { %s2105_s29 = scalar_lea.vmem (%p1540_p4), %s2166_s3, %s1388_s26 }
 0x1bc   : > { %v1240_v15 = vld [vmem:[%s1588_s9] sm:$0xff]  ;;  %v1242_v20 = vld [vmem:[%s1588_s9 + $0x8] sm:$0xff]  ;;  %v1244_v9 = vld [vmem:[%s1588_s9 + $0x10] sm:$0xff] }
 0x1bd   : > { %1241 = vst [vmem:[%s2105_s29] sm:$0xff] %v1240_v15  ;;  %v1246_v16 = vld [vmem:[%s1588_s9 + $0x18] sm:$0xff]  ;;  %v1248_v36 = vld [vmem:[%s1588_s9 + $0x20] sm:$0xff]  ;;  %v1250_v39 = vld [vmem:[%s1588_s9 + $0x28] sm:$0xff] }
 0x1be   : > { %1243 = vst [vmem:[%s2105_s29 + $0x8] sm:$0xff] %v1242_v20  ;;  %v1252_v2 = vld [vmem:[%s1588_s9 + $0x30] sm:$0xff]  ;;  %v1254_v18 = vld [vmem:[%s1588_s9 + $0x38] sm:$0xff]  ;;  %v1256_v3 = vld [vmem:[%s1588_s9 + $0x40] sm:$0xff] }
 0x1bf   : > { %1245 = vst [vmem:[%s2105_s29 + $0x10] sm:$0xff] %v1244_v9  ;;  %v1258_v31 = vld [vmem:[%s1588_s9 + $0x48] sm:$0xff]  ;;  %v1260_v5 = vld [vmem:[%s1588_s9 + $0x50] sm:$0xff]  ;;  %v1262_v50 = vld [vmem:[%s1588_s9 + $0x58] sm:$0xff] }
 0x1c0   : > { %1247 = vst [vmem:[%s2105_s29 + $0x18] sm:$0xff] %v1246_v16  ;;  %v1264_v7 = vld [vmem:[%s1588_s9 + $0x60] sm:$0xff]  ;;  %v1266_v4 = vld [vmem:[%s1588_s9 + $0x68] sm:$0xff]  ;;  %v1268_v51 = vld [vmem:[%s1588_s9 + $0x70] sm:$0xff] }
 0x1c1   : > { %1249 = vst [vmem:[%s2105_s29 + $0x40] sm:$0xff] %v1248_v36  ;;  %v1270_v22 = vld [vmem:[%s1588_s9 + $0x78] sm:$0xff]  ;;  %v1272_v34 = vld [vmem:[%s1588_s9 + $0x80] sm:$0xff]  ;;  %v1274_v29 = vld [vmem:[%s1588_s9 + $0x88] sm:$0xff] }
 0x1c2   : > { %1251 = vst [vmem:[%s2105_s29 + $0x48] sm:$0xff] %v1250_v39  ;;  %v1276_v19 = vld [vmem:[%s1588_s9 + $0x90] sm:$0xff]  ;;  %v1278_v49 = vld [vmem:[%s1588_s9 + $0x98] sm:$0xff]  ;;  %v1280_v35 = vld [vmem:[%s1588_s9 + $0xa0] sm:$0xff] }
 0x1c3   : > { %1253 = vst [vmem:[%s2105_s29 + $0x50] sm:$0xff] %v1252_v2  ;;  %v1282_v37 = vld [vmem:[%s1588_s9 + $0xa8] sm:$0xff]  ;;  %v1284_v48 = vld [vmem:[%s1588_s9 + $0xb0] sm:$0xff]  ;;  %v1286_v24 = vld [vmem:[%s1588_s9 + $0xb8] sm:$0xff] }
 0x1c4   : > { %1255 = vst [vmem:[%s2105_s29 + $0x58] sm:$0xff] %v1254_v18 }
 0x1c5   : > { %1257 = vst [vmem:[%s2105_s29 + $0x80] sm:$0xff] %v1256_v3 }
 0x1c6   : > { %1259 = vst [vmem:[%s2105_s29 + $0x88] sm:$0xff] %v1258_v31 }
 0x1c7   : > { %1261 = vst [vmem:[%s2105_s29 + $0x90] sm:$0xff] %v1260_v5 }
 0x1c8   : > { %1263 = vst [vmem:[%s2105_s29 + $0x98] sm:$0xff] %v1262_v50 }
 0x1c9   : > { %1265 = vst [vmem:[%s2105_s29 + $0xc0] sm:$0xff] %v1264_v7 }
 0x1ca   : > { %1267 = vst [vmem:[%s2105_s29 + $0xc8] sm:$0xff] %v1266_v4 }
 0x1cb   : > { %1269 = vst [vmem:[%s2105_s29 + $0xd0] sm:$0xff] %v1268_v51 }
 0x1cc   : > { %1271 = vst [vmem:[%s2105_s29 + $0xd8] sm:$0xff] %v1270_v22 }
 0x1cd   : > { %1273 = vst [vmem:[%s2105_s29 + $0x100] sm:$0xff] %v1272_v34 }
 0x1ce   : > { %1275 = vst [vmem:[%s2105_s29 + $0x108] sm:$0xff] %v1274_v29 }
 0x1cf   : > { %1277 = vst [vmem:[%s2105_s29 + $0x110] sm:$0xff] %v1276_v19 }
 0x1d0   : > { %1279 = vst [vmem:[%s2105_s29 + $0x118] sm:$0xff] %v1278_v49 }
 0x1d1   : > { %1281 = vst [vmem:[%s2105_s29 + $0x140] sm:$0xff] %v1280_v35 }
 0x1d2   : > { %1283 = vst [vmem:[%s2105_s29 + $0x148] sm:$0xff] %v1282_v37 }
 0x1d3   : > { %1285 = vst [vmem:[%s2105_s29 + $0x150] sm:$0xff] %v1284_v48 }
 0x1d4   : > { %1287 = vst [vmem:[%s2105_s29 + $0x158] sm:$0xff] %v1286_v24 }
 0x1d5 PF: > { %p10_p9 = scmp.ge.s32.totalorder %s1530_s16, 4   ;;  %s2218_s12 = smov %s1473_s13 }
 0x1d6   : > { %s2219_s13 = smov %s1538_s19  ;;  %s2220_s14 = smov %s1530_s16 }
 0x1d7   :  { %12 = sbr.rel (!%p10_p9) target bundleno = 2 (0x2), region = 107 }

</bundles_post_ra>
